<compile_context>
chip_gen: v7x
topology: tpu7x:2x2x1
jax: 0.10.0
libtpu: 0.0.40
codegen_flags: <defaults>
</compile_context>

<pallas_src>
import functools

import jax
import jax.numpy as jnp
from jax.experimental import pallas as pl
from jax.experimental.pallas import tpu as pltpu


# ----------------------------------------------------------------------------
# Kernel: grid = (B / block_b, L_p / l_tile).
# One grid step processes `block_b` batch elements x `l_tile` phrase rows.
# ----------------------------------------------------------------------------
def _semantic_alignment_kernel(phr_ref, vis_ref, W_ref, U_ref, b_ref, w_ref,
                               aligned_ref, weights_ref, energies_ref,
                               uvt_ref, *, t_dtype):
    f32 = jnp.float32
    bt, lt, q = phr_ref.shape
    _, n_v, f = vis_ref.shape
    bn = W_ref.shape[1]

    # --- Once per batch tile (first L_p tile): project vis_feats and keep
    #     Uv^T resident in VMEM scratch, reused by every L_p tile of this batch
    #     tile.  One minor-dims transpose (f32, XLU) amortized over all L tiles.
    @pl.when(pl.program_id(1) == 0)
    def _():
        vis = vis_ref[...].astype(t_dtype)                      # (Bt, N_v, F)
        Um = U_ref[...].astype(t_dtype)                         # (F, bn)
        Uv = jnp.dot(vis.reshape(bt * n_v, f), Um,
                     preferred_element_type=f32).reshape(bt, n_v, bn)
        uvt_ref[...] = jnp.transpose(Uv, (0, 2, 1)).astype(uvt_ref.dtype)

    # --- Per (batch tile, L_p tile) ------------------------------------------
    phr = phr_ref[...].astype(t_dtype)                           # (Bt, Lt, Q)
    Wm = W_ref[...].astype(t_dtype)                              # (Q, bn)
    Wh = jnp.dot(phr.reshape(bt * lt, q), Wm,
                 preferred_element_type=f32).reshape(bt, lt, bn)
    # Fold the bias here (L*bn adds) instead of inside the 4-D broadcast.
    Wh = Wh + b_ref[...].reshape(1, 1, bn)

    # Additive-attention energies with N_v on the lane axis:
    #   t[b,l,k,n] = tanh(Wh[b,l,k] + Uv[b,n,k])
    uvt = uvt_ref[...].astype(t_dtype)                           # (Bt, bn, N_v)
    t = jnp.tanh(Wh.astype(t_dtype)[:, :, :, None] + uvt[:, None, :, :])
    # bn -> 1 projection: VPU multiply + sublane-axis reduction, f32 accumulate.
    w_col = w_ref[...].reshape(1, 1, bn, 1).astype(t_dtype)
    energies = jnp.sum((t * w_col).astype(f32), axis=2)          # (Bt, Lt, N_v)

    # Softmax over the visual-feature axis (PyTorch dim=2), kept in f32.
    weights = jax.nn.softmax(energies, axis=-1)                  # (Bt, Lt, N_v)

    # Batched weights @ vis_feats: contract the shared N_v axis directly.
    vis_c = vis_ref[...].astype(t_dtype)
    aligned = jnp.einsum("bln,bnf->blf", weights.astype(t_dtype), vis_c,
                         preferred_element_type=f32)             # (Bt, Lt, F)

    aligned_ref[...] = aligned.astype(aligned_ref.dtype)
    weights_ref[...] = weights.astype(weights_ref.dtype)
    energies_ref[...] = energies.astype(energies_ref.dtype)


# ----------------------------------------------------------------------------
# VMEM-budgeted tiling: pick (block_b, l_tile) so the per-step footprint fits
# the budget, preferring enough grid steps for pipelining / both v7x cores.
# ----------------------------------------------------------------------------
def _choose_tiles(B, L_p, N_v, Q, F, bn, t_bytes, vmem_budget_bytes,
                  target_steps=8):
    f32b = 4

    def divisors_desc(n):
        return [d for d in range(n, 0, -1) if n % d == 0]

    def footprint(bb, lt):
        # double-buffered pipelined input + output blocks
        io = 2 * bb * (lt * Q + N_v * F) * f32b
        io += 2 * bb * lt * (F + 2 * N_v) * f32b
        io += 2 * (Q * bn + F * bn + 2 * bn) * f32b
        # resident Uv^T scratch
        scratch = bb * bn * N_v * t_bytes
        # dominant live intermediates of one step
        live = bb * lt * bn * N_v * t_bytes                      # tanh tensor
        live += bb * lt * (bn + 2 * N_v + F) * f32b              # Wh/energies/weights/aligned
        return io + scratch + live

    # L_p tile: biggest divisor that (a) keeps the BlockSpec's second-minor dim
    # either the full extent or a multiple of 8, (b) is <= 64 rows, (c) fits the
    # VMEM budget at block_b = 1.  Fall back to the smallest legal tile.
    cands = [d for d in divisors_desc(L_p) if d == L_p or d % 8 == 0]
    l_tile = cands[-1]
    for lt in cands:
        if lt <= 64 and footprint(1, lt) <= vmem_budget_bytes:
            l_tile = lt
            break
    n_l = L_p // l_tile

    # Batch tile: largest divisor of B that fits the budget while keeping enough
    # total grid steps (pipelining depth; >= 2 steps per v7x TensorCore).
    want_steps = min(target_steps, B * n_l)
    block_b = 1
    for bb in divisors_desc(B):
        if footprint(bb, l_tile) <= vmem_budget_bytes and (B // bb) * n_l >= want_steps:
            block_b = bb
            break
    return block_b, l_tile


def _tpu_prefers_bf16():
    # bf16 tanh/VPU/MXU path pays off on v6e/v7x (bf16-native VPU/EUP, halves the
    # hot intermediate); on v5e (no bf16 VPU/EUP) or unknown devices keep f32.
    try:
        kind = jax.devices()[0].device_kind.lower()
    except Exception:
        return False
    return ("v6" in kind) or ("v7" in kind)


# ----------------------------------------------------------------------------
# Wrapper
# ----------------------------------------------------------------------------
def semantic_alignment(phr_feats, vis_feats, params, *,
                       block_b=None, l_tile=None, use_bf16=None):
    B, L_p, Q = phr_feats.shape
    B2, N_v, F = vis_feats.shape
    assert B == B2
    bn = params["W"].shape[1]
    assert params["W"].shape == (Q, bn)
    assert params["U"].shape == (F, bn)
    assert params["b"].shape == (1, bn)
    assert params["w"].shape == (1, bn)

    if use_bf16 is None:
        use_bf16 = _tpu_prefers_bf16()
    t_dtype = jnp.bfloat16 if use_bf16 else jnp.float32
    t_bytes = 2 if use_bf16 else 4

    # 64 MiB is <= per-core physical VMEM on every generation (v7x = 64 MiB/TC);
    # budget the per-step footprint well below it to leave Mosaic headroom.
    vmem_limit = 64 * 1024 * 1024
    vmem_budget = int(0.6 * vmem_limit)

    auto_bb, auto_lt = _choose_tiles(B, L_p, N_v, Q, F, bn, t_bytes, vmem_budget)
    if block_b is None:
        block_b = auto_bb
    if l_tile is None:
        l_tile = auto_lt
    assert B % block_b == 0 and L_p % l_tile == 0
    grid = (B // block_b, L_p // l_tile)

    def param_spec(shape):
        return pl.BlockSpec(shape, lambda b, l: (0, 0))

    in_specs = [
        pl.BlockSpec((block_b, l_tile, Q), lambda b, l: (b, l, 0)),   # phr_feats
        pl.BlockSpec((block_b, N_v, F),    lambda b, l: (b, 0, 0)),   # vis_feats (reused across l)
        param_spec((Q, bn)),                                          # W
        param_spec((F, bn)),                                          # U
        param_spec((1, bn)),                                          # b
        param_spec((1, bn)),                                          # w
    ]
    out_specs = (
        pl.BlockSpec((block_b, l_tile, F),   lambda b, l: (b, l, 0)),  # aligned_vis_feats
        pl.BlockSpec((block_b, l_tile, N_v), lambda b, l: (b, l, 0)),  # weights
        pl.BlockSpec((block_b, l_tile, N_v), lambda b, l: (b, l, 0)),  # energies
    )
    out_shape = (
        jax.ShapeDtypeStruct((B, L_p, F), jnp.float32),
        jax.ShapeDtypeStruct((B, L_p, N_v), jnp.float32),
        jax.ShapeDtypeStruct((B, L_p, N_v), jnp.float32),
    )

    kernel = functools.partial(_semantic_alignment_kernel, t_dtype=t_dtype)
    return pl.pallas_call(
        kernel,
        out_shape=out_shape,
        grid=grid,
        in_specs=in_specs,
        out_specs=out_specs,
        scratch_shapes=[pltpu.VMEM((block_b, bn, N_v), t_dtype)],     # resident Uv^T
        compiler_params=pltpu.CompilerParams(
            dimension_semantics=("parallel", "arbitrary"),
            vmem_limit_bytes=vmem_limit),
    )(phr_feats, vis_feats, params["W"], params["U"], params["b"], params["w"])


# ----------------------------------------------------------------------------
# Pure-JAX reference (mirrors the PyTorch module) for correctness checks.
# ----------------------------------------------------------------------------
def _reference(phr_feats, vis_feats, params):
    Wh = phr_feats @ params["W"]
    Uv = vis_feats @ params["U"]
    t = jnp.tanh(Wh[:, :, None, :] + Uv[:, None, :, :] + params["b"][0])
    energies = jnp.sum(t * params["w"][0], axis=-1)
    weights = jax.nn.softmax(energies, axis=2)
    aligned = jnp.einsum("bln,bnf->blf", weights, vis_feats)
    return aligned, weights, energies


if __name__ == "__main__":
    # Small, consistent shapes.
    B = 4
    L_p = 8            # number of phrase tokens
    N_v = 8            # number of visual features
    query_size = 32
    feat_size = 32
    bottleneck = 32

    root = jax.random.PRNGKey(0)
    k_phr, k_vis, k_w, k_u, k_wvec = jax.random.split(root, 5)
    phr_feats = jax.random.normal(k_phr, (B, L_p, query_size), dtype=jnp.float32)
    vis_feats = jax.random.normal(k_vis, (B, N_v, feat_size), dtype=jnp.float32)
    params = {
        # stored as (in_features, out_features) = transpose of nn.Linear.weight
        "W": 0.1 * jax.random.normal(k_w, (query_size, bottleneck), dtype=jnp.float32),
        "U": 0.1 * jax.random.normal(k_u, (feat_size, bottleneck), dtype=jnp.float32),
        "b": jnp.ones((1, bottleneck), dtype=jnp.float32),   # PyTorch inits b to ones
        "w": 0.1 * jax.random.normal(k_wvec, (1, bottleneck), dtype=jnp.float32),
    }

    ref_aligned, ref_weights, ref_energies = _reference(phr_feats, vis_feats, params)

    # f32 compute path (default on v5e / unknown): exact check.
    a32, wt32, e32 = jax.block_until_ready(
        semantic_alignment(phr_feats, vis_feats, params, use_bf16=False))
    assert a32.shape == (B, L_p, feat_size)
    assert wt32.shape == (B, L_p, N_v)
    assert e32.shape == (B, L_p, N_v)
    assert bool(jnp.all(jnp.isfinite(a32)))
    assert jnp.allclose(a32, ref_aligned, atol=1e-5, rtol=1e-5)
    assert jnp.allclose(wt32, ref_weights, atol=1e-5, rtol=1e-5)
    assert jnp.allclose(e32, ref_energies, atol=1e-5, rtol=1e-5)

    # bf16 tanh/MXU path (default on v6e/v7x): looser tolerances (f32 accumulate
    # and softmax keep it well-behaved).
    a16, wt16, e16 = jax.block_until_ready(
        semantic_alignment(phr_feats, vis_feats, params, use_bf16=True))
    assert bool(jnp.all(jnp.isfinite(a16)))
    assert jnp.allclose(e16, ref_energies, atol=5e-2, rtol=5e-2)
    assert jnp.allclose(wt16, ref_weights, atol=2e-2, rtol=5e-2)
    assert jnp.allclose(a16, ref_aligned, atol=5e-2, rtol=5e-2)

    # Auto (chip-dependent) path — just make sure the default dispatch runs.
    jax.block_until_ready(semantic_alignment(phr_feats, vis_feats, params))

    print("KERNEL_OK")
</pallas_src>

<mosaic_0001>
module attributes {stable_mosaic.version = 11 : i64} {
  func.func @_semantic_alignment_kernel(%arg0: i32, %arg1: i32, %arg2: memref<1x8x32xf32, #tpu.memory_space<vmem>>, %arg3: memref<1x8x32xf32, #tpu.memory_space<vmem>>, %arg4: memref<32x32xf32, #tpu.memory_space<vmem>>, %arg5: memref<32x32xf32, #tpu.memory_space<vmem>>, %arg6: memref<1x32xf32, #tpu.memory_space<vmem>>, %arg7: memref<1x32xf32, #tpu.memory_space<vmem>>, %arg8: memref<1x8x32xf32, #tpu.memory_space<vmem>>, %arg9: memref<1x8x8xf32, #tpu.memory_space<vmem>>, %arg10: memref<1x8x8xf32, #tpu.memory_space<vmem>>, %arg11: memref<1x32x8xf32, #tpu.memory_space<vmem>>) attributes {dimension_semantics = [#tpu.dimension_semantics<parallel>, #tpu.dimension_semantics<arbitrary>], iteration_bounds = array<i64: 4, 1>, scalar_prefetch = 0 : i64, scratch_operands = 1 : i64, tpu.core_type = #tpu.core_type<tc>, window_params = [{transform_indices = @transform_0, window_bounds = array<i64: 1, 8, 32>}, {transform_indices = @transform_1, window_bounds = array<i64: 1, 8, 32>}, {pipeline_mode = #tpu.pipeline_mode<synchronous>, transform_indices = @transform_2, window_bounds = array<i64: 32, 32>}, {pipeline_mode = #tpu.pipeline_mode<synchronous>, transform_indices = @transform_3, window_bounds = array<i64: 32, 32>}, {pipeline_mode = #tpu.pipeline_mode<synchronous>, transform_indices = @transform_4, window_bounds = array<i64: 1, 32>}, {pipeline_mode = #tpu.pipeline_mode<synchronous>, transform_indices = @transform_5, window_bounds = array<i64: 1, 32>}, {transform_indices = @transform_6, window_bounds = array<i64: 1, 8, 32>}, {transform_indices = @transform_7, window_bounds = array<i64: 1, 8, 8>}, {transform_indices = @transform_8, window_bounds = array<i64: 1, 8, 8>}]} {
    %c0_i32 = arith.constant 0 : i32
    %0 = arith.cmpi eq, %arg1, %c0_i32 : i32
    %1 = arith.extui %0 : i1 to i32
    %c0_i32_0 = arith.constant 0 : i32
    %2 = arith.cmpi ne, %1, %c0_i32_0 : i32
    scf.if %2 {
      %c0_29 = arith.constant 0 : index
      %c0_30 = arith.constant 0 : index
      %c0_31 = arith.constant 0 : index
      %40 = vector.load %arg3[%c0_29, %c0_30, %c0_31] : memref<1x8x32xf32, #tpu.memory_space<vmem>>, vector<1x8x32xf32>
      %c0_32 = arith.constant 0 : index
      %c0_33 = arith.constant 0 : index
      %41 = vector.load %arg5[%c0_32, %c0_33] : memref<32x32xf32, #tpu.memory_space<vmem>>, vector<32x32xf32>
      %42 = vector.shape_cast %40 : vector<1x8x32xf32> to vector<8x32xf32>
      %cst_34 = arith.constant dense<0.000000e+00> : vector<8x32xf32>
      %43 = tpu.matmul %42, %41, %cst_34 {dimension_numbers = #tpu.dot_dimension_numbers<[1], [0], [0], [1], [0, 0, 1, 1], [], []>} : vector<8x32xf32>, vector<32x32xf32>, vector<8x32xf32> -> vector<8x32xf32>
      %44 = vector.shape_cast %43 : vector<8x32xf32> to vector<1x8x32xf32>
      %45 = tpu.transpose %44, [0, 2, 1] : vector<1x8x32xf32> -> vector<1x32x8xf32>
      %c0_35 = arith.constant 0 : index
      %c0_36 = arith.constant 0 : index
      %c0_37 = arith.constant 0 : index
      %46 = vector.load %arg11[%c0_35, %c0_36, %c0_37] : memref<1x32x8xf32, #tpu.memory_space<vmem>>, vector<1x32x8xf32>
      tpu.vector_store %arg11[%c0_35, %c0_36, %c0_37], %45 {strides = array<i32>} : memref<1x32x8xf32, #tpu.memory_space<vmem>>, vector<1x32x8xf32>,
    } else {
    }
    %c0 = arith.constant 0 : index
    %c0_1 = arith.constant 0 : index
    %c0_2 = arith.constant 0 : index
    %3 = vector.load %arg2[%c0, %c0_1, %c0_2] : memref<1x8x32xf32, #tpu.memory_space<vmem>>, vector<1x8x32xf32>
    %c0_3 = arith.constant 0 : index
    %c0_4 = arith.constant 0 : index
    %4 = vector.load %arg4[%c0_3, %c0_4] : memref<32x32xf32, #tpu.memory_space<vmem>>, vector<32x32xf32>
    %5 = vector.shape_cast %3 : vector<1x8x32xf32> to vector<8x32xf32>
    %cst = arith.constant dense<0.000000e+00> : vector<8x32xf32>
    %6 = tpu.matmul %5, %4, %cst {dimension_numbers = #tpu.dot_dimension_numbers<[1], [0], [0], [1], [0, 0, 1, 1], [], []>} : vector<8x32xf32>, vector<32x32xf32>, vector<8x32xf32> -> vector<8x32xf32>
    %7 = vector.shape_cast %6 : vector<8x32xf32> to vector<1x8x32xf32>
    %c0_5 = arith.constant 0 : index
    %c0_6 = arith.constant 0 : index
    %8 = vector.load %arg6[%c0_5, %c0_6] : memref<1x32xf32, #tpu.memory_space<vmem>>, vector<1x32xf32>
    %9 = vector.shape_cast %8 : vector<1x32xf32> to vector<1x1x32xf32>
    %10 = vector.broadcast %9 : vector<1x1x32xf32> to vector<1x8x32xf32>
    %11 = arith.addf %7, %10 : vector<1x8x32xf32>
    %c0_7 = arith.constant 0 : index
    %c0_8 = arith.constant 0 : index
    %c0_9 = arith.constant 0 : index
    %12 = vector.load %arg11[%c0_7, %c0_8, %c0_9] : memref<1x32x8xf32, #tpu.memory_space<vmem>>, vector<1x32x8xf32>
    %13 = vector.shape_cast %11 : vector<1x8x32xf32> to vector<1x8x32x1xf32>
    %14 = vector.shape_cast %12 : vector<1x32x8xf32> to vector<1x1x32x8xf32>
    %15 = vector.broadcast %13 : vector<1x8x32x1xf32> to vector<1x8x32x8xf32>
    %16 = vector.broadcast %14 : vector<1x1x32x8xf32> to vector<1x8x32x8xf32>
    %17 = arith.addf %15, %16 : vector<1x8x32x8xf32>
    %18 = math.tanh %17 : vector<1x8x32x8xf32>
    %c0_10 = arith.constant 0 : index
    %c0_11 = arith.constant 0 : index
    %19 = vector.load %arg7[%c0_10, %c0_11] : memref<1x32xf32, #tpu.memory_space<vmem>>, vector<1x32xf32>
    %20 = vector.shape_cast %19 : vector<1x32xf32> to vector<1x1x32x1xf32>
    %21 = vector.broadcast %20 : vector<1x1x32x1xf32> to vector<1x8x32x8xf32>
    %22 = arith.mulf %18, %21 : vector<1x8x32x8xf32>
    %cst_12 = arith.constant dense<0.000000e+00> : vector<1x8x8xf32>
    %23 = vector.multi_reduction <add>, %22, %cst_12 [2] : vector<1x8x32x8xf32> to vector<1x8x8xf32>
    %cst_13 = arith.constant dense<0xFF800000> : vector<1x8xf32>
    %24 = vector.multi_reduction <maximumf>, %23, %cst_13 [2] : vector<1x8x8xf32> to vector<1x8xf32>
    %cst_14 = arith.constant 0xFF800000 : f32
    %25 = vector.broadcast %cst_14 : f32 to vector<1x8xf32>
    %26 = arith.maximumf %25, %24 : vector<1x8xf32>
    %27 = vector.shape_cast %26 : vector<1x8xf32> to vector<1x8x1xf32>
    %28 = vector.broadcast %27 : vector<1x8x1xf32> to vector<1x8x8xf32>
    %29 = arith.subf %23, %28 : vector<1x8x8xf32>
    %30 = math.exp %29 : vector<1x8x8xf32>
    %cst_15 = arith.constant dense<0.000000e+00> : vector<1x8xf32>
    %31 = vector.multi_reduction <add>, %30, %cst_15 [2] : vector<1x8x8xf32> to vector<1x8xf32>
    %32 = vector.shape_cast %31 : vector<1x8xf32> to vector<1x8x1xf32>
    %33 = vector.broadcast %32 : vector<1x8x1xf32> to vector<1x8x8xf32>
    %34 = arith.divf %30, %33 : vector<1x8x8xf32>
    %c0_16 = arith.constant 0 : index
    %c0_17 = arith.constant 0 : index
    %c0_18 = arith.constant 0 : index
    %35 = vector.load %arg3[%c0_16, %c0_17, %c0_18] : memref<1x8x32xf32, #tpu.memory_space<vmem>>, vector<1x8x32xf32>
    "tpu.trace_start"() <{level = 10 : i32, message = "bln,bnf->blf"}> : () -> ()
    %cst_19 = arith.constant dense<0.000000e+00> : vector<1x8x32xf32>
    %36 = tpu.matmul %34, %35, %cst_19 {dimension_numbers = #tpu.dot_dimension_numbers<[2], [1], [1], [2], [0, 0, 0, 1, 1, 2], [0], [0]>} : vector<1x8x8xf32>, vector<1x8x32xf32>, vector<1x8x32xf32> -> vector<1x8x32xf32>
    "tpu.trace_stop"() : () -> ()
    %c0_20 = arith.constant 0 : index
    %c0_21 = arith.constant 0 : index
    %c0_22 = arith.constant 0 : index
    %37 = vector.load %arg8[%c0_20, %c0_21, %c0_22] : memref<1x8x32xf32, #tpu.memory_space<vmem>>, vector<1x8x32xf32>
    tpu.vector_store %arg8[%c0_20, %c0_21, %c0_22], %36 {strides = array<i32>} : memref<1x8x32xf32, #tpu.memory_space<vmem>>, vector<1x8x32xf32>,
    %c0_23 = arith.constant 0 : index
    %c0_24 = arith.constant 0 : index
    %c0_25 = arith.constant 0 : index
    %38 = vector.load %arg9[%c0_23, %c0_24, %c0_25] : memref<1x8x8xf32, #tpu.memory_space<vmem>>, vector<1x8x8xf32>
    tpu.vector_store %arg9[%c0_23, %c0_24, %c0_25], %34 {strides = array<i32>} : memref<1x8x8xf32, #tpu.memory_space<vmem>>, vector<1x8x8xf32>,
    %c0_26 = arith.constant 0 : index
    %c0_27 = arith.constant 0 : index
    %c0_28 = arith.constant 0 : index
    %39 = vector.load %arg10[%c0_26, %c0_27, %c0_28] : memref<1x8x8xf32, #tpu.memory_space<vmem>>, vector<1x8x8xf32>
    tpu.vector_store %arg10[%c0_26, %c0_27, %c0_28], %23 {strides = array<i32>} : memref<1x8x8xf32, #tpu.memory_space<vmem>>, vector<1x8x8xf32>,
    return
  }
  func.func @transform_0(%arg0: i32, %arg1: i32) -> (i32, i32, i32) {
    %c0_i32 = arith.constant 0 : i32
    %c0_i32_0 = arith.constant 0 : i32
    return %arg0, %arg1, %c0_i32 : i32, i32, i32
  }
  func.func @transform_1(%arg0: i32, %arg1: i32) -> (i32, i32, i32) {
    %c0_i32 = arith.constant 0 : i32
    %c0_i32_0 = arith.constant 0 : i32
    %c0_i32_1 = arith.constant 0 : i32
    return %arg0, %c0_i32, %c0_i32_0 : i32, i32, i32
  }
  func.func @transform_2(%arg0: i32, %arg1: i32) -> (i32, i32) {
    %c0_i32 = arith.constant 0 : i32
    %c0_i32_0 = arith.constant 0 : i32
    %c0_i32_1 = arith.constant 0 : i32
    return %c0_i32, %c0_i32_0 : i32, i32
  }
  func.func @transform_3(%arg0: i32, %arg1: i32) -> (i32, i32) {
    %c0_i32 = arith.constant 0 : i32
    %c0_i32_0 = arith.constant 0 : i32
    %c0_i32_1 = arith.constant 0 : i32
    return %c0_i32, %c0_i32_0 : i32, i32
  }
  func.func @transform_4(%arg0: i32, %arg1: i32) -> (i32, i32) {
    %c0_i32 = arith.constant 0 : i32
    %c0_i32_0 = arith.constant 0 : i32
    %c0_i32_1 = arith.constant 0 : i32
    return %c0_i32, %c0_i32_0 : i32, i32
  }
  func.func @transform_5(%arg0: i32, %arg1: i32) -> (i32, i32) {
    %c0_i32 = arith.constant 0 : i32
    %c0_i32_0 = arith.constant 0 : i32
    %c0_i32_1 = arith.constant 0 : i32
    return %c0_i32, %c0_i32_0 : i32, i32
  }
  func.func @transform_6(%arg0: i32, %arg1: i32) -> (i32, i32, i32) {
    %c0_i32 = arith.constant 0 : i32
    %c0_i32_0 = arith.constant 0 : i32
    return %arg0, %arg1, %c0_i32 : i32, i32, i32
  }
  func.func @transform_7(%arg0: i32, %arg1: i32) -> (i32, i32, i32) {
    %c0_i32 = arith.constant 0 : i32
    %c0_i32_0 = arith.constant 0 : i32
    return %arg0, %arg1, %c0_i32 : i32, i32, i32
  }
  func.func @transform_8(%arg0: i32, %arg1: i32) -> (i32, i32, i32) {
    %c0_i32 = arith.constant 0 : i32
    %c0_i32_0 = arith.constant 0 : i32
    return %arg0, %arg1, %c0_i32 : i32, i32, i32
  }
}

</mosaic_0001>

<bundles_post_ra>
// kernel: tpu_custom_call.1
= control target key start
LH: loop header
LB: loop body
LE: loop exit
PB: predicated region body
PF: predicated region fallthrough
CT: control target
= control target key end

     0   :  { %s2795_s0 = inlined_call_operand.hbm [shape: f32[4,8,32], index: 0, kind: input, shape index: {}]   ;;  %s2796_s1 = inlined_call_operand.hbm [shape: f32[4,8,32], index: 1, kind: input, shape index: {}]   ;;  %s2797_s2 = inlined_call_operand.hbm [shape: f32[32,32], index: 2, kind: input, shape index: {}]   ;;  %s2798_s3 = inlined_call_operand.hbm [shape: f32[32,32], index: 3, kind: input, shape index: {}]   ;;  %s2799_s4 = inlined_call_operand.hbm [shape: f32[1,32], index: 4, kind: input, shape index: {}]   ;;  %s2800_s5 = inlined_call_operand.hbm [shape: f32[1,32], index: 5, kind: input, shape index: {}]   ;;  %s2801_s6 = inlined_call_operand.hbm [shape: f32[4,8,32], index: 6, kind: output, shape index: {0}]   ;;  %s2802_s7 = inlined_call_operand.hbm [shape: f32[4,8,8], index: 7, kind: output, shape index: {1}]   ;;  %s2803_s8 = inlined_call_operand.hbm [shape: f32[4,8,8], index: 8, kind: output, shape index: {2}]  }
   0x1   :  { %2812 = sst [smem:[#allocation26_spill]] %s2797_s2 }
   0x2   :  { %2813 = sst [smem:[#allocation27_spill]] %s2798_s3 }
   0x3   :  { %2814 = sst [smem:[#allocation28_spill]] %s2799_s4 }
   0x4   :  { %2815 = sst [smem:[#allocation29_spill]] %s2800_s5 }
   0x5   :  { %2816 = sst [smem:[#allocation30_spill]] %s2801_s6 }
   0x6   :  { %2817 = sst [smem:[#allocation31_spill]] %s2803_s8 }
   0x7   :  { %14 = vsyncpa [#allocation4], 0 }
   0x8   :  { %16 = vsyncpa [#allocation4 + $0x1], 0 }
   0x9   :  { %17 = vsyncpa [#allocation7], 0 }
   0xa   :  { %19 = vsyncpa [#allocation7 + $0x1], 0 }
   0xb   :  { %20 = vsyncpa [#allocation10], 0 }
   0xc   :  { %21 = vsyncpa [#allocation13], 0 }
   0xd   :  { %22 = vsyncpa [#allocation5], 0 }
   0xe   :  { %24 = vsyncpa [#allocation5 + $0x1], 0 }
   0xf   :  { %25 = vsyncpa [#allocation16], 0 }
  0x10   :  { %27 = vsyncpa [#allocation16 + $0x1], 0  ;;  %s2211_s27 = smov 0   ;;  %s2213_s28 = smov 0  }
  0x11   :  { %s2215_s29 = smov 0   ;;  %s2217_s30 = smov 0  }
  0x12   :  { %s2219_s9 = smov 0   ;;  %s2221_s10 = smov 0  }
  0x13 LB: > { %s2242_s11 = sadd.s32 4294967295, %s2150_s10   ;;  %p1517_p0 = scmp.ge.s32.totalorder %s2150_s10, 1  ;;  %s2150_s10 = sphi %s2221_s10, %s33_s10   ;;  %s2146_s9 = sphi %s2219_s9, %s2851_s9   ;;  %s2142_s30 = sphi %s2217_s30, %s2850_s30   ;;  %s2138_s29 = sphi %s2215_s29, %s2849_s29   ;;  %s2134_s28 = sphi %s2213_s28, %s2848_s28   ;;  %s2130_s27 = sphi %s2211_s27, %s2847_s27  }
  0x14   : > { %p2806_p1 = scmp.eq.s32.totalorder %s2242_s11, 0  ;;  %p272_p2 = scmp.lt.s32.totalorder %s2150_s10, 5 }
  0x15   : > { %s2152_s13 = smov [#allocation8]   ;;  %s2153_s16 = smov [#allocation9]  }
  0x16   : > { %p2247_p3 = pnand %p1517_p0, %p272_p2  ;;  %s284_s14 = sshll.u32 %s2152_s13, 4  ;;  %s2251_s14 = int_to_ptr.vmem [resolvable:$true] %s284_s14 }
  0x17   : > { %s297_s17 = sshll.u32 %s2153_s16, 4  ;;  %s2154_s18 = smov [#allocation11]   ;;  %s2261_s17 = int_to_ptr.vmem [resolvable:$true] %s297_s17 }
  0x18   : > { %s2818_s12 = scalar_select %p2247_p3, 1, 0 }
  0x19   : > { %p1627_p4 = pneg %p2247_p3  ;;  %s2263_s19 = sshll.u32 %s2154_s18, 4  ;;  %s312_s19 = int_to_ptr.vmem [resolvable:$true] %s2263_s19 }
  0x1a   : > { %s2820_s2 = sld [smem:[#allocation26_spill]] }
  0x1b   : > { %p2257_p5 = pnand %p1627_p4, %p2806_p1 }
  0x1d   : > { %p2273_p7 = pneg %p2257_p5 }
  0x20   : > { %s1820_s22 = scalar_lea.hbm %s2820_s2, 512 }
  0x21   : > { %p1821_p6 = scmp.ne.s32.totalorder %s2820_s2, %s1820_s22  ;;  %p1827_p10 = scmp.lt.u32.totalorder %s1820_s22, %s2820_s2 }
  0x23   : > { %p1823_p8 = pnand %p2273_p7, %p1821_p6 }
  0x25   : > { %p1824_p9 = pneg %p1823_p8 }
  0x27   : > { %p1829_p11 = pnand %p1827_p10, %p1824_p9 }
  0x29   : > { %1832 = shalt.err (!%p1829_p11)
}
  0x2a   : > { %s1833_s16 = scalar_lea.vmem %s2251_s14, 512  ;;  %p1841_p2 = scmp.lt.s32.totalorder %s2251_s14, %s2251_s14 }
  0x2b   : > { %p1834_p12 = scmp.ne.s32.totalorder %s2251_s14, %s1833_s16  ;;  %p1842_p4 = scmp.lt.s32.totalorder %s1833_s16, %s1833_s16 }
  0x2d   : > { %p1836_p13 = pnand %p1834_p12, %p2273_p7  ;;  %p1843_p6 = por %p1842_p4, %p1841_p2 }
  0x2f   : > { %p1837_p0 = pneg %p1836_p13 }
  0x31   : > { %p1844_p8 = pnand %p1843_p6, %p1837_p0 }
  0x33   : > { %1847 = shalt.err (!%p1844_p8)
}
  0x34   : > { %s2155_s18 = smov 128   ;;  %s2156_s20 = smov 8  }
  0x35   : > { %1630 = dma.hbm_to_vmem [thread:$0]  (!%p2257_p5), %s2820_s2, 512, %s2251_s14, [#allocation7], %s2155_s18, %s2155_s18, %s2156_s20  }
  0x36   : > { %s2822_s3 = sld [smem:[#allocation27_spill]] }
  0x3c   : > { %s1848_s26 = scalar_lea.hbm %s2822_s3, 512 }
  0x3d   : > { %p1849_p9 = scmp.ne.s32.totalorder %s2822_s3, %s1848_s26  ;;  %p1855_p12 = scmp.lt.u32.totalorder %s1848_s26, %s2822_s3 }
  0x3f   : > { %p1851_p10 = pnand %p1849_p9, %p2273_p7 }
  0x41   : > { %p1852_p11 = pneg %p1851_p10 }
  0x43   : > { %p1857_p13 = pnand %p1855_p12, %p1852_p11 }
  0x45   : > { %1860 = shalt.err (!%p1857_p13)
}
  0x46   : > { %s1861_s14 = scalar_lea.vmem %s2261_s17, 512  ;;  %p1869_p6 = scmp.lt.s32.totalorder %s2261_s17, %s2261_s17 }
  0x47   : > { %p1862_p0 = scmp.ne.s32.totalorder %s2261_s17, %s1861_s14  ;;  %p1870_p8 = scmp.lt.s32.totalorder %s1861_s14, %s1861_s14 }
  0x49   : > { %p1864_p2 = pnand %p1862_p0, %p2273_p7  ;;  %p1871_p9 = por %p1870_p8, %p1869_p6 }
  0x4b   : > { %p1865_p4 = pneg %p1864_p2 }
  0x4d   : > { %p1872_p10 = pnand %p1871_p9, %p1865_p4 }
  0x4f   : > { %1875 = shalt.err (!%p1872_p10)
}
  0x50   : > { %1633 = dma.hbm_to_vmem [thread:$0]  (!%p2257_p5), %s2822_s3, 512, %s2261_s17, [#allocation10], %s2155_s18, %s2155_s18, %s2156_s20  }
  0x51   : > { %s2823_s4 = sld [smem:[#allocation28_spill]] }
  0x57   : > { %s1876_s23 = scalar_lea.hbm %s2823_s4, 16 }
  0x58   : > { %p1877_p11 = scmp.ne.s32.totalorder %s2823_s4, %s1876_s23  ;;  %p1883_p0 = scmp.lt.u32.totalorder %s1876_s23, %s2823_s4 }
  0x5a   : > { %p1879_p12 = pnand %p1877_p11, %p2273_p7 }
  0x5c   : > { %p1880_p13 = pneg %p1879_p12 }
  0x5e   : > { %p1885_p2 = pnand %p1883_p0, %p1880_p13 }
  0x60   : > { %1888 = shalt.err (!%p1885_p2)
}
  0x61   : > { %s1889_s14 = scalar_lea.vmem %s312_s19, 16  ;;  %s1896_s17 = scalar_lea.vmem %s312_s19, 32 }
  0x62   : > { %p1890_p4 = scmp.ne.s32.totalorder %s312_s19, %s1889_s14  ;;  %p1897_p9 = scmp.lt.s32.totalorder %s312_s19, %s312_s19 }
  0x63   : > { %p1898_p10 = scmp.lt.s32.totalorder %s1896_s17, %s1889_s14 }
  0x64   : > { %p1892_p6 = pnand %p1890_p4, %p2273_p7 }
  0x65   : > { %p1899_p1 = por %p1898_p10, %p1897_p9 }
  0x66   : > { %p1893_p8 = pneg %p1892_p6 }
  0x68   : > { %p1900_p3 = pnand %p1899_p1, %p1893_p8 }
  0x6a   : > { %1903 = shalt.err (!%p1900_p3)
}
  0x6b   : > { %1636 = dma.hbm_to_vmem [thread:$0]  (!%p2257_p5), %s2823_s4, 16, %s312_s19, [#allocation10]  }
  0x6c   : > { %s2157_s6 = smov [#allocation12]   ;;  %s2824_s5 = sld [smem:[#allocation29_spill]] }
  0x6d   : > { %s322_s8 = sshll.u32 %s2157_s6, 4  ;;  %s323_s8 = int_to_ptr.vmem [resolvable:$true] %s322_s8 }
  0x72   : > { %s1904_s23 = scalar_lea.hbm %s2824_s5, 16 }
  0x73   : > { %p1905_p11 = scmp.ne.s32.totalorder %s2824_s5, %s1904_s23  ;;  %p1911_p12 = scmp.lt.u32.totalorder %s1904_s23, %s2824_s5 }
  0x75   : > { %p1907_p1 = pnand %p1905_p11, %p2273_p7 }
  0x77   : > { %p1908_p3 = pneg %p1907_p1 }
  0x79   : > { %p1913_p13 = pnand %p1911_p12, %p1908_p3 }
  0x7b   : > { %1916 = shalt.err (!%p1913_p13)
}
  0x7c   : > { %s1917_s19 = scalar_lea.vmem %s323_s8, 16  ;;  %s1924_s14 = scalar_lea.vmem %s323_s8, 32 }
  0x7d   : > { %p1918_p0 = scmp.ne.s32.totalorder %s323_s8, %s1917_s19  ;;  %p1925_p6 = scmp.lt.s32.totalorder %s323_s8, %s323_s8 }
  0x7e   : > { %p1926_p8 = scmp.lt.s32.totalorder %s1924_s14, %s1917_s19 }
  0x7f   : > { %p1920_p2 = pnand %p1918_p0, %p2273_p7 }
  0x80   : > { %p1927_p9 = por %p1926_p8, %p1925_p6 }
  0x81   : > { %p1921_p4 = pneg %p1920_p2 }
  0x83   : > { %p1928_p10 = pnand %p1927_p9, %p1921_p4 }
  0x85   : > { %1931 = shalt.err (!%p1928_p10)
}
  0x86   : > { %1639 = dma.hbm_to_vmem [thread:$0]  (!%p2257_p5), %s2824_s5, 16, %s323_s8, [#allocation13]  }
  0x87   : > { %s2808_s25 = sadd.s32 4294967294, %s2150_s10   ;;  %s45_s20 = sadd.s32 1, %s2146_s9 }
  0x88   : > { %p47_p7 = scmp.ge.s32.totalorder %s45_s20, 4  ;;  %s54_s15 = sadd.s32 1, %s2138_s29 }
  0x89   : > { %p61_p11 = scmp.ne.s32.totalorder %s2138_s29, %s2134_s28  ;;  %p62_p1 = scmp.eq.s32.totalorder %s2150_s10, 0 }
  0x8a   : > { %s2853_s20 = smov (%p47_p7, %s45_s20), 0  ;;  %p67_p12 = scmp.ne.s32.totalorder %s2134_s28, %s2130_s27 }
  0x8b   : > { %2825 = sst [smem:[#allocation25_spill]] %s2853_s20  ;;  %p2362_p3 = por %p62_p1, %p61_p11 }
  0x8c   : > { %s49_s8 = ssub.s32 %s2146_s9, %s2853_s20  ;;  %p203_p5 = scmp.eq.s32.totalorder %s2242_s11, 3 }
  0x8d   : > { %p52_p13 = scmp.eq.s32.totalorder %s49_s8, 0  ;;  %p2827_p0 = scmp.eq.s32.totalorder %s2242_s11, 0 }
  0x8e   : > { %p2377_p4 = por %p203_p5, %p61_p11  ;;  %p209_p6 = scmp.eq.s32.totalorder %s2808_s25, 3 }
  0x8f   : > { %p2373_p2 = por %p2827_p0, %p67_p12  ;;  %p1661_p9 = scmp.lt.s32.totalorder %s2150_s10, 4 }
  0x90   : > { %s2829_s22 = scalar_select %p2377_p4, 1, 0 }
  0x91   : > { %s2828_s21 = scalar_select %p2373_p2, 1, 0 }
  0x92   : > { %s2384_s23 = scalar_select %p52_p13, %s2138_s29, %s54_s15  }
  0x93   : > { %p2386_p8 = por %p209_p6, %p67_p12  ;;  %s333_s26 = sand.u32 1, %s2138_s29  }
  0x94   : > { %s1524_s13 = sshll.u32 %s2146_s9, 7  ;;  %s2393_s16 = sshll.u32 %s333_s26, 3 }
  0x95   : > { %s2830_s24 = scalar_select %p2386_p8, 1, 0 }
  0x96   : > { %s2398_s17 = scalar_lea.hbm %s2795_s0, %s1524_s13  ;;  %s337_s18 = scalar_lea.vmem [#allocation3], %s2393_s16 }
  0x97   : > { %s345_s15 = sshll.u32 %s337_s18, 4  ;;  %p2403_p10 = pnand %p1661_p9, %p2362_p3  ;;  %s2407_s15 = int_to_ptr.vmem [resolvable:$true] %s345_s15 }
  0x98   : > { %s2412_s14 = scalar_lea.hbm %s2796_s1, %s1524_s13  ;;  %s334_s2 = scalar_lea.sflag [#allocation4], %s333_s26 }
  0x99   : > { %s1932_s3 = scalar_lea.hbm %s2398_s17, 128  ;;  %p1934_p11 = pneg %p2403_p10 }
  0x9a   : > { %p1933_p7 = scmp.ne.s32.totalorder %s2398_s17, %s1932_s3  ;;  %s1937_s4 = scalar_lea.hbm %s2795_s0, 512 }
  0x9b   : > { %p1938_p12 = scmp.lt.u32.totalorder %s2398_s17, %s2795_s0  ;;  %p1939_p5 = scmp.lt.u32.totalorder %s1937_s4, %s1932_s3 }
  0x9c   : > { %p1935_p1 = pnand %p1934_p11, %p1933_p7  ;;  %p1941_p0 = scmp.lt.u32.totalorder %s1932_s3, %s2398_s17 }
  0x9d   : > { %p1940_p13 = por %p1939_p5, %p1938_p12 }
  0x9e   : > { %p1936_p3 = pneg %p1935_p1 }
  0x9f   : > { %p1942_p6 = por %p1941_p0, %p1940_p13 }
  0xa1   : > { %p1943_p9 = pnand %p1942_p6, %p1936_p3 }
  0xa3   : > { %1946 = shalt.err (!%p1943_p9)
}
  0xa4   : > { %s1947_s25 = scalar_lea.vmem %s2407_s15, 128  ;;  %s2158_s26 = smov [#allocation3]  }
  0xa5   : > { %p1948_p7 = scmp.ne.s32.totalorder %s2407_s15, %s1947_s25  ;;  %s1952_s13 = sshll.u32 %s2158_s26, 4  ;;  %s1953_s13 = int_to_ptr.vmem [resolvable:$false] %s1952_s13 }
  0xa6   : > { %s1954_s5 = scalar_lea.vmem %s1953_s13, 256  ;;  %p1955_p4 = scmp.lt.s32.totalorder %s2407_s15, %s1953_s13 }
  0xa7   : > { %p1950_p1 = pnand %p1948_p7, %p1934_p11  ;;  %p1956_p12 = scmp.lt.s32.totalorder %s1954_s5, %s1947_s25 }
  0xa9   : > { %p1951_p8 = pneg %p1950_p1  ;;  %p1957_p5 = por %p1956_p12, %p1955_p4 }
  0xab   : > { %p1958_p13 = pnand %p1957_p5, %p1951_p8 }
  0xad   : > { %1961 = shalt.err (!%p1958_p13)
}
  0xae   : > { %1643 = dma.hbm_to_vmem [thread:$0]  (!%p2403_p10), %s2398_s17, 128, %s2407_s15, %s334_s2  }
  0xaf   : > { %s352_s3 = sand.u32 1, %s2150_s10   ;;  %s356_s4 = scalar_lea.vmem [#allocation6], %s2393_s16 }
  0xb0   : > { %s363_s20 = sshll.u32 %s356_s4, 4  ;;  %s353_s19 = scalar_lea.sflag [#allocation7], %s352_s3  ;;  %s364_s20 = int_to_ptr.vmem [resolvable:$true] %s363_s20 }
  0xb1   : > { %s1962_s6 = scalar_lea.hbm %s2412_s14, 128  ;;  %s1967_s26 = scalar_lea.hbm %s2796_s1, 512 }
  0xb2   : > { %p1963_p4 = scmp.ne.s32.totalorder %s2412_s14, %s1962_s6  ;;  %p1968_p0 = scmp.lt.u32.totalorder %s2412_s14, %s2796_s1 }
  0xb3   : > { %p1969_p6 = scmp.lt.u32.totalorder %s1967_s26, %s1962_s6  ;;  %p1971_p7 = scmp.lt.u32.totalorder %s1962_s6, %s2412_s14 }
  0xb4   : > { %p1965_p8 = pnand %p1963_p4, %p1934_p11 }
  0xb5   : > { %p1970_p9 = por %p1969_p6, %p1968_p0 }
  0xb6   : > { %p1966_p3 = pneg %p1965_p8 }
  0xb7   : > { %p1972_p1 = por %p1971_p7, %p1970_p9 }
  0xb9   : > { %p1973_p12 = pnand %p1972_p1, %p1966_p3 }
  0xbb   : > { %1976 = shalt.err (!%p1973_p12)
}
  0xbc   : > { %s1977_s2 = scalar_lea.vmem %s364_s20, 128  ;;  %s2159_s16 = smov [#allocation6]  }
  0xbd   : > { %p1978_p5 = scmp.ne.s32.totalorder %s364_s20, %s1977_s2  ;;  %s1982_s17 = sshll.u32 %s2159_s16, 4  ;;  %s1983_s17 = int_to_ptr.vmem [resolvable:$false] %s1982_s17 }
  0xbe   : > { %s1984_s15 = scalar_lea.vmem %s1983_s17, 256  ;;  %p1985_p8 = scmp.lt.s32.totalorder %s364_s20, %s1983_s17 }
  0xbf   : > { %p1980_p13 = pnand %p1978_p5, %p1934_p11  ;;  %p1986_p2 = scmp.lt.s32.totalorder %s1984_s15, %s1977_s2 }
  0xc1   : > { %p1981_p4 = pneg %p1980_p13  ;;  %p1987_p0 = por %p1986_p2, %p1985_p8 }
  0xc3   : > { %p1988_p6 = pnand %p1987_p0, %p1981_p4 }
  0xc5   : > { %1991 = shalt.err (!%p1988_p6)
}
  0xc6   : > { %1646 = dma.hbm_to_vmem [thread:$0]  (!%p2403_p10), %s2412_s14, 128, %s364_s20, %s353_s19  }
  0xc7   : > { %p2832_p3 = scmp.ne.s32.totalorder %s2818_s12, 0 }
  0xc8   : > { %s2463_s3 = sand.u32 (!%p2832_p3), 1, %s2134_s28   ;;  %p2833_p2 = scmp.ne.s32.totalorder (!%p2832_p3), %s2828_s21, 0 }
  0xc9   : > { %372 = sbr.rel (%p2832_p3) target bundleno = 1306 (0x51a), region = 44  ;;  %s2466_s4 = sshll.u32 (!%p2832_p3), %s2463_s3, 3 }
  0xca   : > { %s375_s6 = scalar_lea.sflag (!%p2832_p3), [#allocation4], %s2463_s3  ;;  %s378_s18 = scalar_lea.vmem (!%p2832_p3), [#allocation3], %s2466_s4 }
  0xd0   : > { %2101 = dma.done.wait (%p2833_p2), %s375_s6, 128  }
  0xd1   : > { %2103 = vsyncadd (%p2833_p2), %s375_s6, 4294967168  ;;  %s383_s12 = sand.u32 1, %s2242_s11   ;;  %s387_s14 = scalar_lea.vmem [#allocation6], %s2466_s4 }
  0xd2   : > { %s384_s8 = scalar_lea.sflag [#allocation7], %s383_s12 }
  0xd3   : > { %2105 = dma.done.wait (%p2833_p2), %s384_s8, 128  }
  0xd4   : > { %2107 = vsyncadd (%p2833_p2), %s384_s8, 4294967168  ;;  %p2834_p10 = scmp.eq.s32.totalorder %s2242_s11, 0 }
  0xd6   : > { %2109 = dma.done.wait (%p2834_p10), [#allocation7], 512   ;;  %p2835_p11 = pmov %p2834_p10 }
  0xd7   : > { %p2836_p9 = pmov %p2834_p10 }
  0xd8   : > { %2111 = vsyncadd (%p2835_p11), [#allocation7], 4294966784 }
  0xd9   : > { %2113 = dma.done.wait (%p2836_p9), [#allocation10], 528   ;;  %p2837_p7 = pmov %p2836_p9 }
  0xdb   : > { %2115 = vsyncadd (%p2837_p7), [#allocation10], 4294966768  ;;  %p2838_p1 = pmov %p2837_p7 }
  0xdd   : > { %2117 = dma.done.wait (%p2838_p1), [#allocation13], 16   ;;  %p2839_p12 = pmov %p2838_p1 }
  0xde   : > { %v2160_v0 = vmov 0.0|0.0   ;;  %vm2161_vm0 = vmmov 0   ;;  %v2162_v1 = vmov 0.0   ;;  %v572_v2 = vld [vmem:[#allocation8] sm:$0xff]  ;;  %v573_v3 = vld [vmem:[#allocation8 + $0x8] sm:$0xff]  ;;  %v574_v4 = vld [vmem:[#allocation8 + $0x10] sm:$0xff]  ;;  %v662_v16 = vlaneseq }
  0xdf   : > { %2119 = vsyncadd (%p2839_p12), [#allocation13], 4294967280  ;;  %1595 = vmatprep.subr.bf16.mxu1 %v2160_v0  ;;  %1581 = vmatprep.mubr.msk.f32.mxu1 %vm2161_vm0, %v2162_v1  ;;  %v1596_v5 = vpack.c.bf16 %v573_v3, %v572_v2  ;;  %v575_v6 = vld [vmem:[#allocation8 + $0x18] sm:$0xff]  ;;  %v456_v7 = vld [vmem:[#allocation9] sm:$0xff]  ;;  %vm460_vm1 = vcmask 261120   ;;  %vm566_vm2 = vcmask 64512  }
  0xe0   : > { %1589 = vmatprep.subr.bf16.mxu0 %v2160_v0  ;;  %1570 = vmatprep.mubr.msk.f32.mxu0 %vm2161_vm0, %v2162_v1  ;;  %v457_v8 = vld [vmem:[#allocation9 + $0x8] sm:$0xff]  ;;  %v458_v9 = vld [vmem:[#allocation9 + $0x10] sm:$0xff]  ;;  %v459_v10 = vld [vmem:[#allocation9 + $0x18] sm:$0xff]  ;;  %v1599_v11 = vpack.c.bf16 %v575_v6, %v574_v4  ;;  %v663_v17 = vshrl.u32 %v662_v16, 7  ;;  %vm1043_vm3 = vcmask 1041409   ;;  %vm1045_vm4 = vcmask 1042434  }
  0xe1   : > { %1597 = vmatpush3.bf16.msra.mxu1 %v1596_v5  ;;  %v1590_v12 = vpack.c.bf16 %v457_v8, %v456_v7  ;;  %v1593_v13 = vpack.c.bf16 %v459_v10, %v458_v9  ;;  %v571_v14 = vld [vmem:[%s378_s18] sm:$0xff]  ;;  %v455_v15 = vld [vmem:[%s387_s14] sm:$0xff]  ;;  %vm1047_vm5 = vcmask 1043459   ;;  %vm1049_vm6 = vcmask 1044484   ;;  %s450_s21 = scalar_lea.vmem [#allocation17], %s2466_s4  ;;  %s443_s20 = scalar_lea.vmem [#allocation15], %s2466_s4 }
  0xe2   : > { %1598 = vmatprep.subr.bf16.mxu1 %v2160_v0  ;;  %v1539_v18 = vld [vmem:[#allocation11] ss:$0 sm:$0xff]  ;;  %v683_v19 = vsub.s32 1, %v663_v17  ;;  %v664_v20 = vsub.s32 0, %v663_v17  ;;  %v702_v28 = vsub.s32 2, %v663_v17  ;;  %v721_v30 = vsub.s32 3, %v663_v17 }
  0xe3   : > { %1591 = vmatpush3.bf16.msra.mxu0 %v1590_v12  ;;  %v740_v32 = vsub.s32 4, %v663_v17  ;;  %v759_v34 = vsub.s32 5, %v663_v17  ;;  %v778_v36 = vsub.s32 6, %v663_v17  ;;  %v797_v38 = vsub.s32 7, %v663_v17  ;;  %v1540_v40 = vld [vmem:[#allocation12] ss:$0 sm:$0xff] }
  0xe4   : > { %1592 = vmatprep.subr.bf16.mxu0 %v2160_v0  ;;  %vm1051_vm7 = vcmask 1045509   ;;  %vm1053_vm8 = vcmask 1046534   ;;  %vm1055_vm9 = vcmask 1047559   ;;  %s2683_s19 = sshll.u32 %s2142_s30, 7  ;;  %s1297_s5 = sshll.u32 %s443_s20, 4  ;;  %s1298_s5 = int_to_ptr.vmem [resolvable:$true] %s1297_s5 }
  0xe5   : > { %1600 = vmatpush3.bf16.msra.mxu1 %v1599_v11  ;;  %s2689_s13 = scalar_lea.hbm %s2802_s7, %s2683_s19  ;;  %s2693_s2 = scalar_lea.sflag [#allocation16], %s383_s12 }
  0xe6   : > { %s1992_s16 = scalar_lea.vmem %s1298_s5, 128  ;;  %p2840_p13 = scmp.ne.s32.totalorder %s2829_s22, 0 }
  0xe7   : > { %1594 = vmatpush3.bf16.msra.mxu0 %v1593_v13  ;;  %p1993_p5 = scmp.ne.s32.totalorder %s1298_s5, %s1992_s16  ;;  %s2163_s17 = smov [#allocation15]  }
  0xe8   : > { %1582 = vmatmul.mubr.msk.f32.vlgmr.msra.gmra.mrb[0].mxu1 %vm460_vm1, %v571_v14  ;;  %1584 = vmatprep.subr.mxu0 %v2162_v1  ;;  %s1996_s15 = sshll.u32 %s2163_s17, 4  ;;  %s1997_s15 = int_to_ptr.vmem [resolvable:$false] %s1996_s15 }
  0xe9   : > { %p1994_p4 = pnand %p1993_p5, %p2840_p13  ;;  %s1998_s30 = scalar_lea.vmem %s1997_s15, 256 }
  0xea   : > { %1571 = vmatmul.mubr.msk.f32.vlgmr.msra.gmra.mrb[0].mxu0 %vm460_vm1, %v455_v15  ;;  %p1999_p0 = scmp.lt.s32.totalorder %s1298_s5, %s1997_s15  ;;  %p2000_p6 = scmp.lt.s32.totalorder %s1998_s30, %s1992_s16 }
  0xeb   : > { %1585 = vmatpush3.msra.mxu0 %v455_v15  ;;  %1586 = vmatprep.mubr.msk.f32.mxu0 %vm2161_vm0, %v2162_v1  ;;  %p1995_p8 = pneg %p1994_p4 }
  0xec   : > { %p2001_p3 = por %p2000_p6, %p1999_p0 }
  0xee   : > { %p2002_p2 = pnand %p2001_p3, %p1995_p8 }
 0x1bb   : > { %v646_v21 = vpop.f32.mrb[0].mxu1 }
 0x1bc   : > { %v657_v22 = vadd.f32 %v1539_v18, %v646_v21  ;;  %v1583_v23 = vpop.f32.mrb[1].mxu1 }
 0x1bd   : > { %v530_v24 = vpop.f32.mrb[0].mxu0 }
 0x1be   : > { %v684_v25 = vrot.slane %v657_v22, %v683_v19  ;;  %v665_v26 = vrot.slane %v657_v22, %v664_v20  ;;  %v1572_v27 = vpop.f32.mrb[1].mxu0  ;;  %v703_v29 = vrot.slane %v657_v22, %v702_v28  ;;  %v722_v31 = vrot.slane %v657_v22, %v721_v30 }
 0x1bf   : > { %v741_v33 = vrot.slane %v657_v22, %v740_v32  ;;  %v760_v35 = vrot.slane %v657_v22, %v759_v34  ;;  %v779_v37 = vrot.slane %v657_v22, %v778_v36  ;;  %v798_v39 = vrot.slane %v657_v22, %v797_v38 }
 0x1c0   : > { %686 = vbcast.lane.b32.xlu1 %v684_v25, 256  ;;  %667 = vbcast.lane.b32.xlu0 %v665_v26, 256 }
 0x1c4   : > { %690 = vbcast.lane.b32.xlu1 %v684_v25, 264  ;;  %671 = vbcast.lane.b32.xlu0 %v665_v26, 264 }
 0x1c8   : > { %709 = vbcast.lane.b32.xlu1 %v703_v29, 264  ;;  %705 = vbcast.lane.b32.xlu0 %v703_v29, 256 }
 0x1cc   : > { %694 = vbcast.lane.b32.xlu1 %v684_v25, 272  ;;  %675 = vbcast.lane.b32.xlu0 %v665_v26, 272 }
 0x1d0   : > { %728 = vbcast.lane.b32.xlu1 %v722_v31, 264  ;;  %724 = vbcast.lane.b32.xlu0 %v722_v31, 256 }
 0x1d4   : > { %743 = vbcast.lane.b32.xlu1 %v741_v33, 256  ;;  %713 = vbcast.lane.b32.xlu0 %v703_v29, 272 }
 0x1d8   : > { %679 = vbcast.lane.b32.xlu1 %v665_v26, 280  ;;  %747 = vbcast.lane.b32.xlu0 %v741_v33, 264 }
 0x1dc   : > { %732 = vbcast.lane.b32.xlu1 %v722_v31, 272  ;;  %698 = vbcast.lane.b32.xlu0 %v684_v25, 280 }
 0x1e0   : > { %766 = vbcast.lane.b32.xlu1 %v760_v35, 264  ;;  %762 = vbcast.lane.b32.xlu0 %v760_v35, 256 }
 0x1e4   : > { %751 = vbcast.lane.b32.xlu1 %v741_v33, 272  ;;  %717 = vbcast.lane.b32.xlu0 %v703_v29, 280 }
 0x1e8   : > { %785 = vbcast.lane.b32.xlu1 %v779_v37, 264  ;;  %781 = vbcast.lane.b32.xlu0 %v779_v37, 256 }
 0x1ec   : > { %770 = vbcast.lane.b32.xlu1 %v760_v35, 272  ;;  %736 = vbcast.lane.b32.xlu0 %v722_v31, 280 }
 0x1f0   : > { %804 = vbcast.lane.b32.xlu1 %v798_v39, 264  ;;  %800 = vbcast.lane.b32.xlu0 %v798_v39, 256 }
 0x1f4   : > { %789 = vbcast.lane.b32.xlu1 %v779_v37, 272  ;;  %755 = vbcast.lane.b32.xlu0 %v741_v33, 280 }
 0x1f8   : > { %808 = vbcast.lane.b32.xlu1 %v798_v39, 272  ;;  %774 = vbcast.lane.b32.xlu0 %v760_v35, 280 }
 0x1fc   : > { %884 = vbcast.lane.b32.xlu1 %v1540_v40, 256  ;;  %793 = vbcast.lane.b32.xlu0 %v779_v37, 280 }
 0x200   : > { %888 = vbcast.lane.b32.xlu1 %v1540_v40, 264 }
 0x204   : > { %812 = vbcast.lane.b32.xlu1 %v798_v39, 280 }
 0x208   : > { %892 = vbcast.lane.b32.xlu1 %v1540_v40, 272 }
 0x20c   : > { %896 = vbcast.lane.b32.xlu1 %v1540_v40, 280 }
 0x21a   : > { %534 = vxpose.xlu0.b32.start.end [1/1] (short) (narrow) %v530_v24, 32 }
 0x232   : > { %v668_v41 = vpop.permute.xlu0 %667  ;;  %v687_v44 = vpop.permute.xlu1 %686 }
 0x236   : > { %v672_v42 = vpop.permute.xlu0 %671  ;;  %v691_v46 = vpop.permute.xlu1 %690 }
 0x23a   : > { %v706_v43 = vpop.permute.xlu0 %705  ;;  %v710_v48 = vpop.permute.xlu1 %709 }
 0x23e   : > { %v676_v45 = vpop.permute.xlu0 %675  ;;  %v695_v50 = vpop.permute.xlu1 %694 }
 0x242   : > { %v725_v47 = vpop.permute.xlu0 %724  ;;  %v729_v52 = vpop.permute.xlu1 %728 }
 0x246   : > { %v714_v49 = vpop.permute.xlu0 %713  ;;  %v744_v54 = vpop.permute.xlu1 %743 }
 0x24a   : > { %v2503_v51 = vpop.permute.xlu0 %747  ;;  %v680_v56 = vpop.permute.xlu1 %679 }
 0x24e   : > { %v2505_v53 = vpop.permute.xlu0 %698  ;;  %v733_v58 = vpop.permute.xlu1 %732 }
 0x252   : > { %v763_v55 = vpop.permute.xlu0 %762  ;;  %v2509_v60 = vpop.permute.xlu1 %766 }
 0x256   : > { %v2507_v57 = vpop.permute.xlu0 %717  ;;  %v752_v62 = vpop.permute.xlu1 %751 }
 0x25a   : > { %v782_v59 = vpop.permute.xlu0 %781  ;;  %v2513_v0 = vpop.permute.xlu1 %785 }
 0x25e   : > { %v2511_v61 = vpop.permute.xlu0 %736  ;;  %v771_v2 = vpop.permute.xlu1 %770 }
 0x262   : > { %v801_v63 = vpop.permute.xlu0 %800  ;;  %v805_v4 = vpop.permute.xlu1 %804 }
 0x266   : > { %v2515_v1 = vpop.permute.xlu0 %755  ;;  %v2521_v6 = vpop.permute.xlu1 %789 }
 0x26a   : > { %v2517_v3 = vpop.permute.xlu0 %774  ;;  %v2524_v9 = vpop.permute.xlu1 %808 }
 0x26e   : > { %v2519_v5 = vpop.permute.xlu0 %793  ;;  %v2528_v15 = vpop.permute.xlu1 %884 }
 0x272   : > { %v2531_v22 = vpop.permute.xlu1 %888 }
 0x276   : > { %v2535_v36 = vpop.permute.xlu1 %812 }
 0x29a   : > { %v550_v7 = vpop.trf.xlu0 }
 0x29b   : > { %567 = vst.msk [vmem:[#allocation2] sm:$0xff] %vm566_vm2, %v550_v7 }
 0x29e   : > { %v551_v8 = vpop.trf.xlu0 }
 0x29f   : > { %568 = vst.msk [vmem:[#allocation2 + $0x8] sm:$0xff] %vm566_vm2, %v551_v8 }
 0x2a2   : > { %v658_v10 = vld [vmem:[#allocation2] sm:$0xff]  ;;  %v552_v11 = vpop.trf.xlu0 }
 0x2a3   : > { %569 = vst.msk [vmem:[#allocation2 + $0x10] sm:$0xff] %vm566_vm2, %v552_v11  ;;  %v814_v12 = vadd.f32 %v668_v41, %v658_v10  ;;  %v818_v13 = vadd.f32 %v687_v44, %v658_v10  ;;  %v822_v14 = vadd.f32 %v706_v43, %v658_v10  ;;  %v826_v26 = vadd.f32 %v725_v47, %v658_v10 }
 0x2a4   : > { %v830_v33 = vadd.f32 %v744_v54, %v658_v10  ;;  %v834_v34 = vadd.f32 %v763_v55, %v658_v10  ;;  %v2538_v38 = vadd.f32 %v782_v59, %v658_v10  ;;  %v2540_v39 = vadd.f32 %v801_v63, %v658_v10 }
 0x2a5   : > { %1724 = vtanh.f32 %v814_v12 }
 0x2a6   : > { %v659_v16 = vld [vmem:[#allocation2 + $0x8] sm:$0xff]  ;;  %v553_v17 = vpop.trf.xlu0  ;;  %1726 = vtanh.f32 %v818_v13 }
 0x2a7   : > { %570 = vst.msk [vmem:[#allocation2 + $0x18] sm:$0xff] %vm566_vm2, %v553_v17  ;;  %v815_v18 = vadd.f32 %v672_v42, %v659_v16  ;;  %v819_v19 = vadd.f32 %v691_v46, %v659_v16  ;;  %v823_v20 = vadd.f32 %v710_v48, %v659_v16  ;;  %1728 = vtanh.f32 %v822_v14 }
 0x2a8   : > { %v827_v27 = vadd.f32 %v729_v52, %v659_v16  ;;  %v831_v42 = vadd.f32 %v2503_v51, %v659_v16  ;;  %v835_v43 = vadd.f32 %v2509_v60, %v659_v16  ;;  %v2549_v46 = vadd.f32 %v2513_v0, %v659_v16  ;;  %v2557_v52 = vpop.permute.xlu1 %892 }
 0x2a9   : > { %1730 = vtanh.f32 %v815_v18  ;;  %v2551_v47 = vadd.f32 %v805_v4, %v659_v16 }
 0x2aa   : > { %v660_v21 = vld [vmem:[#allocation2 + $0x10] sm:$0xff]  ;;  %1732 = vtanh.f32 %v819_v19 }
 0x2ab   : > { %v816_v23 = vadd.f32 %v676_v45, %v660_v21  ;;  %v820_v24 = vadd.f32 %v695_v50, %v660_v21  ;;  %v824_v25 = vadd.f32 %v714_v49, %v660_v21  ;;  %1734 = vtanh.f32 %v823_v20 }
 0x2ac   : > { %v828_v29 = vadd.f32 %v733_v58, %v660_v21  ;;  %v832_v30 = vadd.f32 %v752_v62, %v660_v21  ;;  %v836_v32 = vadd.f32 %v771_v2, %v660_v21  ;;  %v840_v58 = vadd.f32 %v2521_v6, %v660_v21 }
 0x2ad   : > { %1736 = vtanh.f32 %v816_v23  ;;  %v2566_v59 = vadd.f32 %v2524_v9, %v660_v21 }
 0x2ae   : > { %v2533_v28 = vld [vmem:[#allocation2 + $0x18] sm:$0xff]  ;;  %1738 = vtanh.f32 %v820_v24 }
 0x2af   : > { %1740 = vtanh.f32 %v824_v25  ;;  %v1725_v31 = vpop.eup %1724  ;;  %v817_v37 = vadd.f32 %v680_v56, %v2533_v28  ;;  %v821_v41 = vadd.f32 %v2505_v53, %v2533_v28  ;;  %v825_v45 = vadd.f32 %v2507_v57, %v2533_v28 }
 0x2b0   : > { %1742 = vtanh.f32 %v826_v26  ;;  %v1727_v35 = vpop.eup %1726  ;;  %v898_v49 = vmul.f32 %v1725_v31, %v2528_v15  ;;  %v829_v51 = vadd.f32 %v2511_v61, %v2533_v28  ;;  %v833_v55 = vadd.f32 %v2515_v1, %v2533_v28  ;;  %v2588_v26 = vpop.permute.xlu1 %896 }
 0x2b1   : > { %1744 = vtanh.f32 %v827_v27  ;;  %v1729_v40 = vpop.eup %1728  ;;  %v902_v53 = vmul.f32 %v1727_v35, %v2528_v15  ;;  %v837_v62 = vadd.f32 %v2517_v3, %v2533_v28  ;;  %v841_v63 = vadd.f32 %v2519_v5, %v2533_v28 }
 0x2b2   : > { %1746 = vtanh.f32 %v828_v29  ;;  %v906_v54 = vmul.f32 %v1729_v40, %v2528_v15  ;;  %v931_v2 = vsel %vm566_vm2, %v898_v49, 0.0  ;;  %v845_v31 = vadd.f32 %v2535_v36, %v2533_v28 }
 0x2b3   : > { %v1731_v44 = vpop.eup %1730  ;;  %1748 = vtanh.f32 %v832_v30  ;;  %v944_v8 = vsel %vm566_vm2, %v902_v53, 0.0 }
 0x2b4   : > { %v1733_v48 = vpop.eup %1732  ;;  %1750 = vtanh.f32 %v836_v32  ;;  %v899_v50 = vmul.f32 %v1731_v44, %v2531_v22  ;;  %v957_v9 = vsel %vm566_vm2, %v906_v54, 0.0 }
 0x2b5   : > { %1752 = vtanh.f32 %v817_v37  ;;  %v1735_v56 = vpop.eup %1734  ;;  %v903_v57 = vmul.f32 %v1733_v48, %v2531_v22 }
 0x2b6   : > { %1754 = vtanh.f32 %v821_v41  ;;  %v907_v61 = vmul.f32 %v1735_v56, %v2531_v22  ;;  %v932_v4 = vsel %vm566_vm2, %v899_v50, 0.0 }
 0x2b7   : > { %v1737_v60 = vpop.eup %1736  ;;  %1756 = vtanh.f32 %v825_v45  ;;  %v945_v5 = vsel %vm566_vm2, %v903_v57, 0.0  ;;  %v933_v14 = vadd.f32 %v932_v4, %v931_v2 }
 0x2b8   : > { %v1739_v0 = vpop.eup %1738  ;;  %v900_v1 = vmul.f32 %v1737_v60, %v2557_v52  ;;  %1758 = vtanh.f32 %v829_v51  ;;  %v958_v11 = vsel %vm566_vm2, %v907_v61, 0.0  ;;  %v946_v24 = vadd.f32 %v945_v5, %v944_v8 }
 0x2b9   : > { %v1741_v6 = vpop.eup %1740  ;;  %v904_v7 = vmul.f32 %v1739_v0, %v2557_v52  ;;  %1760 = vtanh.f32 %v833_v55  ;;  %v959_v25 = vadd.f32 %v958_v11, %v957_v9 }
 0x2ba   : > { %v1743_v3 = vpop.eup %1742  ;;  %v908_v10 = vmul.f32 %v1741_v6, %v2557_v52  ;;  %1762 = vtanh.f32 %v830_v33  ;;  %v934_v16 = vsel %vm566_vm2, %v900_v1, 0.0 }
 0x2bb   : > { %v1745_v12 = vpop.eup %1744  ;;  %v910_v13 = vmul.f32 %v1743_v3, %v2528_v15  ;;  %1764 = vtanh.f32 %v831_v42  ;;  %v947_v19 = vsel %vm566_vm2, %v904_v7, 0.0  ;;  %v935_v33 = vadd.f32 %v934_v16, %v933_v14 }
 0x2bc   : > { %v1747_v17 = vpop.eup %1746  ;;  %v911_v18 = vmul.f32 %v1745_v12, %v2531_v22  ;;  %v960_v20 = vsel %vm566_vm2, %v908_v10, 0.0  ;;  %1766 = vtanh.f32 %v834_v34  ;;  %v948_v34 = vadd.f32 %v947_v19, %v946_v24 }
 0x2bd   : > { %v1749_v21 = vpop.eup %1748  ;;  %v912_v23 = vmul.f32 %v1747_v17, %v2557_v52  ;;  %1768 = vtanh.f32 %v835_v43  ;;  %v961_v35 = vadd.f32 %v960_v20, %v959_v25  ;;  %v970_v41 = vsel %vm566_vm2, %v910_v13, 0.0 }
 0x2be   : > { %v1751_v27 = vpop.eup %1750  ;;  %v916_v29 = vmul.f32 %v1749_v21, %v2557_v52  ;;  %v971_v30 = vsel %vm566_vm2, %v911_v18, 0.0  ;;  %1770 = vtanh.f32 %v837_v62 }
 0x2bf   : > { %v1753_v32 = vpop.eup %1752  ;;  %1772 = vtanh.f32 %v2538_v38  ;;  %v920_v40 = vmul.f32 %v1751_v27, %v2557_v52  ;;  %v972_v44 = vadd.f32 %v971_v30, %v970_v41  ;;  %v973_v28 = vsel %vm566_vm2, %v912_v23, 0.0 }
 0x2c0   : > { %v1755_v37 = vpop.eup %1754  ;;  %v901_v42 = vmul.f32 %v1753_v32, %v2588_v26  ;;  %1774 = vtanh.f32 %v2549_v46  ;;  %v986_v49 = vsel %vm566_vm2, %v916_v29, 0.0 }
 0x2c1   : > { %v1757_v43 = vpop.eup %1756  ;;  %v905_v36 = vmul.f32 %v1755_v37, %v2588_v26  ;;  %1776 = vtanh.f32 %v840_v58  ;;  %v974_v55 = vadd.f32 %v973_v28, %v972_v44 }
 0x2c2   : > { %v1759_v45 = vpop.eup %1758  ;;  %v909_v48 = vmul.f32 %v1757_v43, %v2588_v26  ;;  %v936_v38 = vsel %vm566_vm2, %v901_v42, 0.0  ;;  %1778 = vtanh.f32 %v841_v63 }
 0x2c3   : > { %v1761_v50 = vpop.eup %1760  ;;  %v913_v51 = vmul.f32 %v1759_v45, %v2588_v26  ;;  %v937_v53 = vadd.f32 %v936_v38, %v935_v33  ;;  %v949_v46 = vsel %vm566_vm2, %v905_v36, 0.0  ;;  %1780 = vtanh.f32 %v2540_v39 }
 0x2c4   : > { %v1763_v54 = vpop.eup %1762  ;;  %v950_v56 = vadd.f32 %v949_v46, %v948_v34  ;;  %v962_v57 = vsel %vm566_vm2, %v909_v48, 0.0  ;;  %1782 = vtanh.f32 %v2551_v47  ;;  %v917_v4 = vmul.f32 %v1761_v50, %v2588_v26 }
 0x2c5   : > { %v1765_v58 = vpop.eup %1764  ;;  %v938_v60 = vrot.slane %v937_v53, 4  ;;  %v963_v61 = vadd.f32 %v962_v57, %v961_v35  ;;  %v975_v62 = vsel %vm566_vm2, %v913_v51, 0.0  ;;  %1784 = vtanh.f32 %v2566_v59 }
 0x2c6   : > { %v1767_v63 = vpop.eup %1766  ;;  %v951_v0 = vrot.slane %v950_v56, 4  ;;  %1786 = vtanh.f32 %v845_v31  ;;  %v914_v1 = vmul.f32 %v1763_v54, %v2528_v15  ;;  %v915_v39 = vmul.f32 %v1765_v58, %v2531_v22 }
 0x2c7   : > { %v1769_v2 = vpop.eup %1768  ;;  %v939_v6 = vadd.f32 %v938_v60, %v937_v53  ;;  %v964_v7 = vrot.slane %v963_v61, 4  ;;  %v976_v47 = vadd.f32 %v975_v62, %v974_v55  ;;  %v918_v9 = vmul.f32 %v1767_v63, %v2528_v15 }
 0x2c8   : > { %v1771_v8 = vpop.eup %1770  ;;  %v952_v3 = vadd.f32 %v951_v0, %v950_v56  ;;  %v984_v10 = vsel %vm566_vm2, %v915_v39, 0.0  ;;  %v999_v59 = vsel %vm566_vm2, %v920_v40, 0.0  ;;  %v983_v14 = vsel %vm566_vm2, %v914_v1, 0.0 }
 0x2c9   : > { %v1773_v5 = vpop.eup %1772  ;;  %v940_v11 = vrot.slane %v939_v6, 2  ;;  %v965_v12 = vadd.f32 %v964_v7, %v963_v61  ;;  %v977_v13 = vrot.slane %v976_v47, 4  ;;  %v919_v17 = vmul.f32 %v1769_v2, %v2531_v22 }
 0x2ca   : > { %v1775_v16 = vpop.eup %1774  ;;  %v921_v18 = vmul.f32 %v1771_v8, %v2588_v26  ;;  %v953_v19 = vrot.slane %v952_v3, 2  ;;  %v985_v20 = vadd.f32 %v984_v10, %v983_v14  ;;  %v988_v27 = vsel %vm566_vm2, %v917_v4, 0.0 }
 0x2cb   : > { %v1777_v21 = vpop.eup %1776  ;;  %v941_v23 = vadd.f32 %v940_v11, %v939_v6  ;;  %v966_v24 = vrot.slane %v965_v12, 2  ;;  %v978_v25 = vadd.f32 %v977_v13, %v976_v47  ;;  %v922_v30 = vmul.f32 %v1773_v5, %v2528_v15 }
 0x2cc   : > { %v1779_v29 = vpop.eup %1778  ;;  %v923_v31 = vmul.f32 %v1775_v16, %v2531_v22  ;;  %v954_v32 = vadd.f32 %v953_v19, %v952_v3  ;;  %v987_v33 = vadd.f32 %v986_v49, %v985_v20  ;;  %v924_v35 = vmul.f32 %v1777_v21, %v2557_v52 }
 0x2cd   : > { %v1781_v34 = vpop.eup %1780  ;;  %v942_v37 = vrot.slane %v941_v23, 1  ;;  %v967_v40 = vadd.f32 %v966_v24, %v965_v12  ;;  %v979_v41 = vrot.slane %v978_v25, 2  ;;  %v996_v28 = vsel %vm566_vm2, %v918_v9, 0.0 }
 0x2ce   : > { %v1783_v42 = vpop.eup %1782  ;;  %v955_v43 = vrot.slane %v954_v32, 1  ;;  %v989_v44 = vadd.f32 %v988_v27, %v987_v33  ;;  %v997_v36 = vsel %vm566_vm2, %v919_v17, 0.0  ;;  %v925_v48 = vmul.f32 %v1779_v29, %v2588_v26 }
 0x2cf   : > { %v1785_v45 = vpop.eup %1784  ;;  %v926_v38 = vmul.f32 %v1781_v34, %v2528_v15  ;;  %v927_v49 = vmul.f32 %v1783_v42, %v2531_v22  ;;  %v968_v50 = vrot.slane %v967_v40, 1  ;;  %v2629_v53 = vadd.f32 %v942_v37, %v941_v23 }
 0x2d0   : > { %v1787_v51 = vpop.eup %1786  ;;  %v980_v46 = vadd.f32 %v979_v41, %v978_v25  ;;  %v990_v54 = vrot.slane %v989_v44, 4  ;;  %v998_v55 = vadd.f32 %v997_v36, %v996_v28  ;;  %v928_v56 = vmul.f32 %v1785_v45, %v2557_v52 }
 0x2d1   : > { %v929_v57 = vmul.f32 %v1787_v51, %v2588_v26  ;;  %v2633_v58 = vadd.f32 %v955_v43, %v954_v32  ;;  %v1001_v60 = vsel %vm566_vm2, %v921_v18, 0.0  ;;  %v1009_v15 = vsel %vm566_vm2, %v922_v30, 0.0 }
 0x2d2   : > { %v991_v61 = vadd.f32 %v990_v54, %v989_v44  ;;  %v1000_v62 = vadd.f32 %v999_v59, %v998_v55  ;;  %v1010_v22 = vsel %vm566_vm2, %v923_v31, 0.0  ;;  %v2638_v63 = vadd.f32 %v968_v50, %v967_v40 }
 0x2d3   : > { %v1011_v0 = vadd.f32 %v1010_v22, %v1009_v15  ;;  %v1012_v1 = vsel %vm566_vm2, %v924_v35, 0.0  ;;  %v1014_v39 = vsel %vm566_vm2, %v925_v48, 0.0  ;;  %v1022_v26 = vsel %vm566_vm2, %v926_v38, 0.0 }
 0x2d4   : > { %v992_v52 = vrot.slane %v991_v61, 2  ;;  %v1002_v2 = vadd.f32 %v1001_v60, %v1000_v62  ;;  %v1023_v4 = vsel %vm566_vm2, %v927_v49, 0.0  ;;  %v981_v6 = vrot.slane %v980_v46, 1 }
 0x2d5   : > { %v1013_v7 = vadd.f32 %v1012_v1, %v1011_v0  ;;  %v1024_v47 = vadd.f32 %v1023_v4, %v1022_v26  ;;  %v1025_v8 = vsel %vm566_vm2, %v928_v56, 0.0  ;;  %v1027_v10 = vsel %vm566_vm2, %v929_v57, 0.0 }
 0x2d6   : > { %v993_v9 = vadd.f32 %v992_v52, %v991_v61  ;;  %v1003_v3 = vrot.slane %v1002_v2, 4  ;;  %v1044_v59 = vsel %vm1043_vm3, %v2633_v58, %v2629_v53  ;;  %v982_v18 = vadd.f32 %v981_v6, %v980_v46 }
 0x2d7   : > { %v1015_v5 = vadd.f32 %v1014_v39, %v1013_v7  ;;  %v1026_v11 = vadd.f32 %v1025_v8, %v1024_v47  ;;  %v1046_v17 = vsel %vm1045_vm4, %v2638_v63, %v1044_v59 }
 0x2d8   : > { %v1004_v12 = vadd.f32 %v1003_v3, %v1002_v2  ;;  %v994_v13 = vrot.slane %v993_v9, 1  ;;  %v1048_v24 = vsel %vm1047_vm5, %v982_v18, %v1046_v17 }
 0x2d9   : > { %v1016_v14 = vrot.slane %v1015_v5, 4  ;;  %v1028_v16 = vadd.f32 %v1027_v10, %v1026_v11 }
 0x2da   : > { %v1005_v19 = vrot.slane %v1004_v12, 2  ;;  %v995_v25 = vadd.f32 %v994_v13, %v993_v9 }
 0x2db   : > { %v1017_v20 = vadd.f32 %v1016_v14, %v1015_v5  ;;  %v1029_v21 = vrot.slane %v1028_v16, 4 }
 0x2dc   : > { %v1006_v23 = vadd.f32 %v1005_v19, %v1004_v12  ;;  %v1050_v33 = vsel %vm1049_vm6, %v995_v25, %v1048_v24 }
 0x2dd   : > { %v1018_v27 = vrot.slane %v1017_v20, 2  ;;  %v1030_v29 = vadd.f32 %v1029_v21, %v1028_v16 }
 0x2de   : > { %v1007_v30 = vrot.slane %v1006_v23, 1 }
 0x2df   : > { %v1019_v31 = vadd.f32 %v1018_v27, %v1017_v20  ;;  %v1031_v32 = vrot.slane %v1030_v29, 2 }
 0x2e0   : > { %v1008_v34 = vadd.f32 %v1007_v30, %v1006_v23 }
 0x2e1   : > { %v1020_v35 = vrot.slane %v1019_v31, 1  ;;  %v1032_v37 = vadd.f32 %v1031_v32, %v1030_v29 }
 0x2e2   : > { %v1052_v40 = vsel %vm1051_vm7, %v1008_v34, %v1050_v33 }
 0x2e3   : > { %v1021_v41 = vadd.f32 %v1020_v35, %v1019_v31  ;;  %v1033_v42 = vrot.slane %v1032_v37, 1 }
 0x2e5   : > { %v1034_v43 = vadd.f32 %v1033_v42, %v1032_v37  ;;  %v1054_v44 = vsel %vm1053_vm8, %v1021_v41, %v1052_v40 }
 0x2e7   : > { %v1056_v28 = vsel %vm1055_vm9, %v1034_v43, %v1054_v44 }
 0x2e8   : > { %v1058_v36 = vsel %vm566_vm2, %v1056_v28, -inf  ;;  %1257 = vst.msk [vmem:[%s450_s21] sm:$0xff] %vm566_vm2, %v1056_v28 }
 0x2e9   : > { %1059 = vmax.xlane.f32.xlu1 %v1058_v36 }
 0x376   : > { %v1060_v45 = vpop.xlane.xlu1 %1059 }
 0x377   : > { %v1062_v48 = vrot.slane %v1060_v45, 1  ;;  %v1063_v38 = vrot.slane %v1060_v45, 2  ;;  %v1064_v49 = vrot.slane %v1060_v45, 3  ;;  %v1065_v50 = vrot.slane %v1060_v45, 4 }
 0x378   : > { %v1066_v51 = vrot.slane %v1060_v45, 5  ;;  %v1067_v46 = vrot.slane %v1060_v45, 6  ;;  %v1068_v54 = vrot.slane %v1060_v45, 7  ;;  %v1077_v55 = vsub.f32 %v2629_v53, %v1060_v45 }
 0x379   : > { %v1078_v56 = vsub.f32 %v2633_v58, %v1062_v48  ;;  %v1079_v57 = vsub.f32 %v2638_v63, %v1063_v38  ;;  %v1080_v60 = vsub.f32 %v982_v18, %v1064_v49  ;;  %v1081_v61 = vsub.f32 %v995_v25, %v1065_v50 }
 0x37a   : > { %v1082_v62 = vsub.f32 %v1008_v34, %v1066_v51  ;;  %v1083_v15 = vsub.f32 %v1021_v41, %v1067_v46  ;;  %v1085_v22 = vmul.f32 1.442695, %v1077_v55  ;;  %v1084_v0 = vsub.f32 %v1034_v43, %v1068_v54 }
 0x37b   : > { %v1087_v1 = vmul.f32 1.442695, %v1078_v56  ;;  %v1089_v39 = vmul.f32 1.442695, %v1079_v57  ;;  %v1091_v52 = vmul.f32 1.442695, %v1080_v60 }
 0x37c   : > { %1788 = vpow2.f32 %v1085_v22  ;;  %v1093_v2 = vmul.f32 1.442695, %v1081_v61  ;;  %v1095_v26 = vmul.f32 1.442695, %v1082_v62  ;;  %v1097_v4 = vmul.f32 1.442695, %v1083_v15 }
 0x37d   : > { %1790 = vpow2.f32 %v1087_v1  ;;  %v1099_v53 = vmul.f32 1.442695, %v1084_v0 }
 0x37e   : > { %1792 = vpow2.f32 %v1089_v39 }
 0x37f   : > { %1794 = vpow2.f32 %v1091_v52 }
 0x380   : > { %1796 = vpow2.f32 %v1093_v2 }
 0x381   : > { %1798 = vpow2.f32 %v1095_v26 }
 0x382   : > { %1800 = vpow2.f32 %v1097_v4 }
 0x383   : > { %1802 = vpow2.f32 %v1099_v53 }
 0x386   : > { %v1789_v58 = vpop.eup %1788 }
 0x387   : > { %v1791_v63 = vpop.eup %1790 }
 0x388   : > { %v1793_v6 = vpop.eup %1792  ;;  %v1109_v7 = vrot.slane %v1791_v63, 7 }
 0x389   : > { %v1795_v47 = vpop.eup %1794  ;;  %v1111_v8 = vrot.slane %v1793_v6, 6 }
 0x38a   : > { %v1797_v9 = vpop.eup %1796  ;;  %v1110_v3 = vsel %vm1043_vm3, %v1109_v7, %v1789_v58  ;;  %v1113_v10 = vrot.slane %v1795_v47, 5 }
 0x38b   : > { %v1799_v59 = vpop.eup %1798  ;;  %v1112_v5 = vsel %vm1045_vm4, %v1111_v8, %v1110_v3  ;;  %v1115_v11 = vrot.slane %v1797_v9, 4 }
 0x38c   : > { %v1801_v12 = vpop.eup %1800  ;;  %v1114_v13 = vsel %vm1047_vm5, %v1113_v10, %v1112_v5  ;;  %v1117_v14 = vrot.slane %v1799_v59, 3 }
 0x38d   : > { %v1803_v16 = vpop.eup %1802  ;;  %v1116_v17 = vsel %vm1049_vm6, %v1115_v11, %v1114_v13  ;;  %v1119_v18 = vrot.slane %v1801_v12, 2 }
 0x38e   : > { %v1118_v19 = vsel %vm1051_vm7, %v1117_v14, %v1116_v17  ;;  %v1121_v20 = vrot.slane %v1803_v16, 1 }
 0x38f   : > { %v1120_v21 = vsel %vm1053_vm8, %v1119_v18, %v1118_v19 }
 0x390   : > { %v1122_v23 = vsel %vm1055_vm9, %v1121_v20, %v1120_v21 }
 0x391   : > { %v1124_v24 = vsel %vm566_vm2, %v1122_v23, 0.0 }
 0x392   : > { %1125 = vadd.xlane.f32.xlu0 %v1124_v24 }
 0x41f   : > { %v1126_v25 = vpop.xlane.xlu0 %1125 }
 0x420   : > { %v1128_v27 = vrot.slane %v1126_v25, 1  ;;  %v1129_v29 = vrot.slane %v1126_v25, 2  ;;  %v1130_v30 = vrot.slane %v1126_v25, 3  ;;  %v1131_v31 = vrot.slane %v1126_v25, 4 }
 0x421   : > { %1804 = vrcp.f32 %v1126_v25  ;;  %v1132_v32 = vrot.slane %v1126_v25, 5  ;;  %v1133_v33 = vrot.slane %v1126_v25, 6  ;;  %v1134_v34 = vrot.slane %v1126_v25, 7 }
 0x422   : > { %1806 = vrcp.f32 %v1128_v27 }
 0x423   : > { %1808 = vrcp.f32 %v1129_v29 }
 0x424   : > { %1810 = vrcp.f32 %v1130_v30 }
 0x425   : > { %1812 = vrcp.f32 %v1131_v31 }
 0x426   : > { %1814 = vrcp.f32 %v1132_v32 }
 0x427   : > { %1816 = vrcp.f32 %v1133_v33 }
 0x428   : > { %1818 = vrcp.f32 %v1134_v34 }
 0x42b   : > { %v1805_v35 = vpop.eup %1804 }
 0x42c   : > { %v1807_v37 = vpop.eup %1806  ;;  %v1144_v28 = vmul.f32 %v1805_v35, %v1789_v58 }
 0x42d   : > { %v1809_v40 = vpop.eup %1808  ;;  %v1146_v41 = vmul.f32 %v1807_v37, %v1791_v63 }
 0x42e   : > { %v1811_v42 = vpop.eup %1810  ;;  %v1148_v43 = vmul.f32 %v1809_v40, %v1793_v6 }
 0x42f   : > { %v1813_v44 = vpop.eup %1812  ;;  %v1150_v36 = vmul.f32 %v1811_v42, %v1795_v47  ;;  %v1168_v45 = vrot.slane %v1146_v41, 7 }
 0x430   : > { %v1815_v48 = vpop.eup %1814  ;;  %v1152_v38 = vmul.f32 %v1813_v44, %v1797_v9  ;;  %v1170_v49 = vrot.slane %v1148_v43, 6 }
 0x431   : > { %v1817_v50 = vpop.eup %1816  ;;  %v1154_v51 = vmul.f32 %v1815_v48, %v1799_v59  ;;  %v1169_v46 = vsel %vm1043_vm3, %v1168_v45, %v1144_v28  ;;  %v1172_v54 = vrot.slane %v1150_v36, 5 }
 0x432   : > { %v1819_v55 = vpop.eup %1818  ;;  %v1156_v56 = vmul.f32 %v1817_v50, %v1801_v12  ;;  %v1171_v57 = vsel %vm1045_vm4, %v1170_v49, %v1169_v46  ;;  %v1174_v60 = vrot.slane %v1152_v38, 4 }
 0x433   : > { %v1158_v61 = vmul.f32 %v1819_v55, %v1803_v16  ;;  %v1173_v62 = vsel %vm1047_vm5, %v1172_v54, %v1171_v57  ;;  %v1176_v15 = vrot.slane %v1154_v51, 3 }
 0x434   : > { %v1175_v22 = vsel %vm1049_vm6, %v1174_v60, %v1173_v62  ;;  %v1178_v0 = vrot.slane %v1156_v56, 2 }
 0x435   : > { %v1177_v1 = vsel %vm1051_vm7, %v1176_v15, %v1175_v22  ;;  %v1180_v39 = vrot.slane %v1158_v61, 1 }
 0x436   : > { %v1179_v52 = vsel %vm1053_vm8, %v1178_v0, %v1177_v1 }
 0x437   : > { %v1181_v2 = vsel %vm1055_vm9, %v1180_v39, %v1179_v52 }
 0x438   : > { %1587 = vmatmul.mubr.msk.f32.vlgmr.msra.gmra.mrb[2].mxu0 %vm566_vm2, %v1181_v2  ;;  %1256 = vst.msk [vmem:[%s443_s20] sm:$0xff] %vm566_vm2, %v1181_v2 }
 0x439   : > { %2005 = shalt.err (!%p2002_p2)
}
 0x43a   : > { %s2006_s11 = scalar_lea.hbm %s2689_s13, 128  ;;  %s2010_s12 = scalar_lea.hbm %s2802_s7, 512 }
 0x43b   : > { %p2007_p10 = scmp.ne.s32.totalorder %s2689_s13, %s2006_s11  ;;  %p2011_p7 = scmp.lt.u32.totalorder %s2689_s13, %s2802_s7 }
 0x43c   : > { %p2012_p1 = scmp.lt.u32.totalorder %s2010_s12, %s2006_s11  ;;  %p2014_p5 = scmp.lt.u32.totalorder %s2006_s11, %s2689_s13 }
 0x43d   : > { %p2008_p11 = pnand %p2007_p10, %p2840_p13 }
 0x43e   : > { %p2013_p12 = por %p2012_p1, %p2011_p7 }
 0x43f   : > { %p2009_p9 = pneg %p2008_p11 }
 0x440   : > { %p2015_p4 = por %p2014_p5, %p2013_p12 }
 0x442   : > { %p2016_p8 = pnand %p2015_p4, %p2009_p9 }
 0x444   : > { %2019 = shalt.err (!%p2016_p8)
}
 0x445   : > { %1622 = dma.vmem_to_hbm [thread:$0]  (%p2840_p13), %s1298_s5, 128, %s2689_s13, %s2693_s2  }
 0x446   : > { %s2841_s26 = sld [smem:[#allocation31_spill]]  ;;  %s1311_s17 = sshll.u32 %s450_s21, 4  ;;  %s1312_s17 = int_to_ptr.vmem [resolvable:$true] %s1311_s17 }
 0x447   : > { %s2020_s15 = scalar_lea.vmem %s1312_s17, 128  ;;  %s2164_s30 = smov [#allocation17]  }
 0x448   : > { %p2021_p0 = scmp.ne.s32.totalorder %s1312_s17, %s2020_s15  ;;  %s2024_s11 = sshll.u32 %s2164_s30, 4  ;;  %s2025_s11 = int_to_ptr.vmem [resolvable:$false] %s2024_s11 }
 0x449   : > { %s2026_s6 = scalar_lea.vmem %s2025_s11, 256  ;;  %p2027_p2 = scmp.lt.s32.totalorder %s1312_s17, %s2025_s11 }
 0x44a   : > { %p2022_p6 = pnand %p2021_p0, %p2840_p13  ;;  %p2028_p10 = scmp.lt.s32.totalorder %s2026_s6, %s2020_s15 }
 0x44c   : > { %s2717_s16 = scalar_lea.hbm %s2841_s26, %s2683_s19  ;;  %p2023_p3 = pneg %p2022_p6 }
 0x44d   : > { %p2029_p11 = por %p2028_p10, %p2027_p2 }
 0x44f   : > { %p2030_p9 = pnand %p2029_p11, %p2023_p3 }
 0x451   : > { %2033 = shalt.err (!%p2030_p9)
}
 0x452   : > { %s2034_s21 = scalar_lea.hbm %s2717_s16, 128  ;;  %s2038_s18 = scalar_lea.hbm %s2841_s26, 512 }
 0x453   : > { %p2035_p7 = scmp.ne.s32.totalorder %s2717_s16, %s2034_s21  ;;  %p2039_p5 = scmp.lt.u32.totalorder %s2717_s16, %s2841_s26 }
 0x454   : > { %p2040_p4 = scmp.lt.u32.totalorder %s2038_s18, %s2034_s21  ;;  %p2042_p0 = scmp.lt.u32.totalorder %s2034_s21, %s2717_s16 }
 0x455   : > { %p2036_p1 = pnand %p2035_p7, %p2840_p13 }
 0x456   : > { %p2041_p8 = por %p2040_p4, %p2039_p5 }
 0x457   : > { %p2037_p12 = pneg %p2036_p1 }
 0x458   : > { %p2043_p6 = por %p2042_p0, %p2041_p8 }
 0x45a   : > { %p2044_p3 = pnand %p2043_p6, %p2037_p12 }
 0x45c   : > { %2047 = shalt.err (!%p2044_p3)
}
 0x45d   : > { %1623 = dma.vmem_to_hbm [thread:$0]  (%p2840_p13), %s1312_s17, 128, %s2717_s16, %s2693_s2  }
 0x45e   : > { %s436_s14 = scalar_lea.vmem [#allocation14], %s2466_s4  ;;  %s2842_s30 = sld [smem:[#allocation30_spill]] }
 0x45f   : > { %s1283_s20 = sshll.u32 %s436_s14, 4  ;;  %s1259_s21 = scalar_lea.sflag [#allocation5], %s2463_s3  ;;  %s2746_s20 = int_to_ptr.vmem [resolvable:$true] %s1283_s20 }
 0x460   : > { %s2048_s13 = scalar_lea.vmem %s2746_s20, 128  ;;  %s2165_s4 = smov [#allocation14]  }
 0x461   : > { %p2049_p2 = scmp.ne.s32.totalorder %s2746_s20, %s2048_s13  ;;  %s2052_s2 = sshll.u32 %s2165_s4, 4  ;;  %s2053_s2 = int_to_ptr.vmem [resolvable:$false] %s2052_s2 }
 0x462   : > { %p2055_p9 = scmp.lt.s32.totalorder %s2746_s20, %s2053_s2 }
 0x463   : > { %p2050_p10 = pnand %p2049_p2, %p2840_p13 }
 0x464   : > { %s2843_s11 = smov %s2842_s30  ;;  %s2744_s6 = scalar_lea.hbm %s2842_s30, %s2683_s19 }
 0x465   : > { %p2051_p11 = pneg %p2050_p10  ;;  %s2054_s19 = scalar_lea.vmem %s2053_s2, 256 }
 0x466   : > { %p2056_p7 = scmp.lt.s32.totalorder %s2054_s19, %s2048_s13 }
 0x468   : > { %p2057_p1 = por %p2056_p7, %p2055_p9 }
 0x46a   : > { %p2058_p12 = pnand %p2057_p1, %p2051_p11 }
 0x50b   : > { %v1250_v26 = vpop.f32.mrb[2].mxu0 }
 0x50c   : > { %1254 = vst.msk [vmem:[%s436_s14] sm:$0xff] %vm460_vm1, %v1250_v26  ;;  %v1588_v4 = vpop.f32.mrb[3].mxu0 }
 0x50d   : > { %2061 = shalt.err (!%p2058_p12)
}
 0x50e   : > { %s2062_s3 = scalar_lea.hbm %s2744_s6, 128  ;;  %s2066_s5 = scalar_lea.hbm %s2843_s11, 512 }
 0x50f   : > { %p2063_p5 = scmp.ne.s32.totalorder %s2744_s6, %s2062_s3  ;;  %p2067_p0 = scmp.lt.u32.totalorder %s2744_s6, %s2843_s11 }
 0x510   : > { %p2068_p6 = scmp.lt.u32.totalorder %s2066_s5, %s2062_s3  ;;  %p2070_p2 = scmp.lt.u32.totalorder %s2062_s3, %s2744_s6 }
 0x511   : > { %p2064_p4 = pnand %p2063_p5, %p2840_p13 }
 0x512   : > { %p2069_p3 = por %p2068_p6, %p2067_p0 }
 0x513   : > { %p2065_p8 = pneg %p2064_p4 }
 0x514   : > { %p2071_p10 = por %p2070_p2, %p2069_p3 }
 0x516   : > { %p2072_p11 = pnand %p2071_p10, %p2065_p8 }
 0x518   : > { %2075 = shalt.err (!%p2072_p11)
}
 0x519   : > { %1621 = dma.vmem_to_hbm [thread:$0]  (%p2840_p13), %s2746_s20, 128, %s2744_s6, %s1259_s21  }
 0x51a PF: > { %p1666_p9 = scmp.ge.s32.totalorder %s2150_s10, 2  ;;  %s1323_s8 = sand.u32 1, %s2130_s27  }
 0x51b   : > { %p2844_p7 = scmp.ne.s32.totalorder %s2830_s24, 0  ;;  %s1324_s14 = scalar_lea.sflag [#allocation5], %s1323_s8 }
 0x51d   : > { %p1648_p1 = pnand %p1666_p9, %p2844_p7 }
 0x51f   : > { %2121 = dma.done.wait (!%p1648_p1), %s1324_s14, 128  }
 0x520   : > { %2123 = vsyncadd (!%p1648_p1), %s1324_s14, 4294967168  ;;  %s2845_s25 = sadd.s32 4294967294, %s2150_s10  }
 0x521   : > { %s1332_s15 = sand.u32 1, %s2845_s25  }
 0x522   : > { %s1333_s30 = scalar_lea.sflag [#allocation16], %s1332_s15 }
 0x523   : > { %2125 = dma.done.wait (!%p1648_p1), %s1333_s30, 256  }
 0x524   : > { %2127 = vsyncadd (!%p1648_p1), %s1333_s30, 4294967040  ;;  %s33_s10 = sadd.s32 1, %s2150_s10   ;;  %s2846_s22 = sld [smem:[#allocation25_spill]] }
 0x525   : > { %p30_p13 = scmp.ge.s32.totalorder %s33_s10, 6   ;;  %s2847_s27 = smov %s2134_s28 }
 0x526   : > { %s2848_s28 = smov %s2138_s29  ;;  %s2849_s29 = smov %s2384_s23 }
 0x527   : > { %s2850_s30 = smov %s2146_s9  ;;  %32 = sbr.rel (!%p30_p13) target bundleno = 19 (0x13), region = 154 }
 0x52a   : > { %s2851_s9 = smov %s2846_s22 }
 0x52e   :  { %1347 = vsyncpa [#allocation4], 1 }
 0x52f   :  { %1349 = vsyncpa [#allocation4 + $0x1], 1 }
 0x530   :  { %1350 = vsyncpa [#allocation7], 1 }
 0x531   :  { %1352 = vsyncpa [#allocation7 + $0x1], 1 }
 0x532   :  { %1353 = vsyncpa [#allocation10], 1 }
 0x533   :  { %1354 = vsyncpa [#allocation13], 1 }
 0x534   :  { %1355 = vsyncpa [#allocation5], 1 }
 0x535   :  { %1357 = vsyncpa [#allocation5 + $0x1], 1 }
 0x536   :  { %1358 = vsyncpa [#allocation16], 1 }
 0x537   :  { %1360 = vsyncpa [#allocation16 + $0x1], 1 }

</bundles_post_ra>
